<compile_context>
chip_gen: v6e
topology: v6e:2x2x1
jax: 0.10.0
libtpu: 0.0.40
codegen_flags: <defaults>
</compile_context>

<pallas_src>
import jax
import jax.numpy as jnp
from jax.experimental import pallas as pl
from jax.experimental.pallas import tpu as pltpu


def mlp_kernel(x_ref, w1_ref, b1_ref, w2_ref, b2_ref, w3_ref, b3_ref, o_ref):
    # One batch-tile of the full 3-layer MLP: 3 MXU matmuls (bf16 in, f32 acc)
    # + 2 VPU bias/ReLU passes in f32.
    x = x_ref[...]  # bf16, fed straight to the MXU (no upcast on the VPU)

    h1 = jnp.dot(x, w1_ref[...], preferred_element_type=jnp.float32) + b1_ref[...]
    h1 = jnp.maximum(h1, 0.0).astype(jnp.bfloat16)

    h2 = jnp.dot(h1, w2_ref[...], preferred_element_type=jnp.float32) + b2_ref[...]
    h2 = jnp.maximum(h2, 0.0).astype(jnp.bfloat16)

    out = jnp.dot(h2, w3_ref[...], preferred_element_type=jnp.float32) + b3_ref[...]
    o_ref[...] = out.astype(o_ref.dtype)


def _round_up(v, m):
    return ((v + m - 1) // m) * m


def discriminator_forward(x, params, *, batch_tile=1024):
    """Run the Discriminator MLP forward pass as a single Pallas kernel.

    x: (B, input_dims) float32 (cast to bf16 for the matmuls internally)
    params: dict with w1 (in,h), b1 (1,h), w2 (h,h), b2 (1,h), w3 (h,o), b3 (1,o), f32.
    Output: (B, output_dims) float32.
    """
    w1f, b1, w2f, b2, w3f, b3 = (params[k] for k in ("w1", "b1", "w2", "b2", "w3", "b3"))
    B, in_dims = x.shape
    hidden = w1f.shape[1]
    out_dims = w3f.shape[1]

    # bf16 operands for the MXU; biases stay f32 (added in f32 on the VPU).
    xb = x.astype(jnp.bfloat16)
    w1 = w1f.astype(jnp.bfloat16)
    w2 = w2f.astype(jnp.bfloat16)
    w3 = w3f.astype(jnp.bfloat16)

    # Clamp the tile to the (sublane-rounded) batch, then pad B so it divides evenly.
    tile = max(8, min(_round_up(batch_tile, 8), _round_up(B, 8)))
    Bp = _round_up(B, tile)
    if Bp != B:
        xb = jnp.pad(xb, ((0, Bp - B), (0, 0)))

    grid = (Bp // tile,)

    # Weights/biases are small: constant index_map keeps them VMEM-resident per step.
    full = lambda shape: pl.BlockSpec(shape, lambda i: (0, 0))

    out = pl.pallas_call(
        mlp_kernel,
        out_shape=jax.ShapeDtypeStruct((Bp, out_dims), jnp.float32),
        grid_spec=pltpu.PrefetchScalarGridSpec(
            num_scalar_prefetch=0,
            grid=grid,
            in_specs=[
                pl.BlockSpec((tile, in_dims), lambda i: (i, 0)),  # x tile (streamed)
                full((in_dims, hidden)),   # w1
                full((1, hidden)),         # b1
                full((hidden, hidden)),    # w2
                full((1, hidden)),         # b2
                full((hidden, out_dims)),  # w3
                full((1, out_dims)),       # b3
            ],
            out_specs=pl.BlockSpec((tile, out_dims), lambda i: (i, 0)),
        ),
        compiler_params=pltpu.CompilerParams(
            dimension_semantics=("parallel",),
        ),
    )(xb, w1, b1, w2, b2, w3, b3)

    return out[:B] if Bp != B else out


def init_params(key, input_dims, hidden_dims, output_dims):
    """Deterministic init mirroring nn.Linear default (uniform +-1/sqrt(fan_in))."""
    ks = jax.random.split(key, 6)

    def linear(kw, kb, fan_in, fan_out):
        bound = 1.0 / jnp.sqrt(fan_in)
        w = jax.random.uniform(kw, (fan_in, fan_out), jnp.float32, -bound, bound)
        b = jax.random.uniform(kb, (1, fan_out), jnp.float32, -bound, bound)
        return w, b

    w1, b1 = linear(ks[0], ks[1], input_dims, hidden_dims)
    w2, b2 = linear(ks[2], ks[3], hidden_dims, hidden_dims)
    w3, b3 = linear(ks[4], ks[5], hidden_dims, output_dims)
    return {"w1": w1, "b1": b1, "w2": w2, "b2": b2, "w3": w3, "b3": b3}


def reference_forward(x, p):
    """Pure-JAX reference with the same bf16-operand / f32-accumulate numerics."""
    xb = x.astype(jnp.bfloat16)
    w1 = p["w1"].astype(jnp.bfloat16)
    w2 = p["w2"].astype(jnp.bfloat16)
    w3 = p["w3"].astype(jnp.bfloat16)
    h1 = jnp.maximum(jnp.dot(xb, w1, preferred_element_type=jnp.float32) + p["b1"], 0.0)
    h1 = h1.astype(jnp.bfloat16)
    h2 = jnp.maximum(jnp.dot(h1, w2, preferred_element_type=jnp.float32) + p["b2"], 0.0)
    h2 = h2.astype(jnp.bfloat16)
    return jnp.dot(h2, w3, preferred_element_type=jnp.float32) + p["b3"]


if __name__ == "__main__":
    key = jax.random.PRNGKey(0)
    k_x, k_p = jax.random.split(key)

    # hidden=128 keeps every intermediate vreg fully lane-dense; batch=2048 with
    # batch_tile=1024 gives a grid of 2 (both TensorCores busy on v7x).
    batch, input_dims, hidden_dims, output_dims = 2048, 32, 128, 4

    x = jax.random.normal(k_x, (batch, input_dims), jnp.float32)
    params = init_params(k_p, input_dims, hidden_dims, output_dims)

    out = discriminator_forward(x, params, batch_tile=1024)
    out = jax.block_until_ready(out)

    ref = reference_forward(x, params)
    assert out.shape == (batch, output_dims)
    assert jnp.allclose(out, ref, atol=1e-2, rtol=1e-2), "mismatch vs reference"

    # Small, non-tile-multiple batch exercises the wrapper-side padding path.
    x_small = jax.random.normal(k_x, (100, input_dims), jnp.float32)
    out_small = jax.block_until_ready(discriminator_forward(x_small, params))
    ref_small = reference_forward(x_small, params)
    assert out_small.shape == (100, output_dims)
    assert jnp.allclose(out_small, ref_small, atol=1e-2, rtol=1e-2), "mismatch (padded batch)"

    print("KERNEL_OK")
</pallas_src>

<mosaic_0001>
module attributes {stable_mosaic.version = 11 : i64} {
  func.func @mlp_kernel(%arg0: i32, %arg1: memref<1024x32xbf16, #tpu.memory_space<vmem>>, %arg2: memref<32x128xbf16, #tpu.memory_space<vmem>>, %arg3: memref<1x128xf32, #tpu.memory_space<vmem>>, %arg4: memref<128x128xbf16, #tpu.memory_space<vmem>>, %arg5: memref<1x128xf32, #tpu.memory_space<vmem>>, %arg6: memref<128x4xbf16, #tpu.memory_space<vmem>>, %arg7: memref<1x4xf32, #tpu.memory_space<vmem>>, %arg8: memref<1024x4xf32, #tpu.memory_space<vmem>>) attributes {dimension_semantics = [#tpu.dimension_semantics<parallel>], iteration_bounds = array<i64: 2>, scalar_prefetch = 0 : i64, scratch_operands = 0 : i64, tpu.core_type = #tpu.core_type<tc>, window_params = [{transform_indices = @transform_0, window_bounds = array<i64: 1024, 32>}, {pipeline_mode = #tpu.pipeline_mode<synchronous>, transform_indices = @transform_1, window_bounds = array<i64: 32, 128>}, {pipeline_mode = #tpu.pipeline_mode<synchronous>, transform_indices = @transform_2, window_bounds = array<i64: 1, 128>}, {pipeline_mode = #tpu.pipeline_mode<synchronous>, transform_indices = @transform_3, window_bounds = array<i64: 128, 128>}, {pipeline_mode = #tpu.pipeline_mode<synchronous>, transform_indices = @transform_4, window_bounds = array<i64: 1, 128>}, {pipeline_mode = #tpu.pipeline_mode<synchronous>, transform_indices = @transform_5, window_bounds = array<i64: 128, 4>}, {pipeline_mode = #tpu.pipeline_mode<synchronous>, transform_indices = @transform_6, window_bounds = array<i64: 1, 4>}, {transform_indices = @transform_7, window_bounds = array<i64: 1024, 4>}]} {
    %c0 = arith.constant 0 : index
    %c0_0 = arith.constant 0 : index
    %0 = vector.load %arg1[%c0, %c0_0] : memref<1024x32xbf16, #tpu.memory_space<vmem>>, vector<1024x32xbf16>
    %c0_1 = arith.constant 0 : index
    %c0_2 = arith.constant 0 : index
    %1 = vector.load %arg2[%c0_1, %c0_2] : memref<32x128xbf16, #tpu.memory_space<vmem>>, vector<32x128xbf16>
    %cst = arith.constant dense<0.000000e+00> : vector<1024x128xf32>
    %2 = tpu.matmul %0, %1, %cst {dimension_numbers = #tpu.dot_dimension_numbers<[1], [0], [0], [1], [0, 0, 1, 1], [], []>} : vector<1024x32xbf16>, vector<32x128xbf16>, vector<1024x128xf32> -> vector<1024x128xf32>
    %c0_3 = arith.constant 0 : index
    %c0_4 = arith.constant 0 : index
    %3 = vector.load %arg3[%c0_3, %c0_4] : memref<1x128xf32, #tpu.memory_space<vmem>>, vector<1x128xf32>
    %4 = vector.broadcast %3 : vector<1x128xf32> to vector<1024x128xf32>
    %5 = arith.addf %2, %4 : vector<1024x128xf32>
    %cst_5 = arith.constant 0.000000e+00 : f32
    %6 = vector.broadcast %cst_5 : f32 to vector<1024x128xf32>
    %7 = arith.maximumf %5, %6 : vector<1024x128xf32>
    %8 = arith.truncf %7 : vector<1024x128xf32> to vector<1024x128xbf16>
    %c0_6 = arith.constant 0 : index
    %c0_7 = arith.constant 0 : index
    %9 = vector.load %arg4[%c0_6, %c0_7] : memref<128x128xbf16, #tpu.memory_space<vmem>>, vector<128x128xbf16>
    %cst_8 = arith.constant dense<0.000000e+00> : vector<1024x128xf32>
    %10 = tpu.matmul %8, %9, %cst_8 {dimension_numbers = #tpu.dot_dimension_numbers<[1], [0], [0], [1], [0, 0, 1, 1], [], []>} : vector<1024x128xbf16>, vector<128x128xbf16>, vector<1024x128xf32> -> vector<1024x128xf32>
    %c0_9 = arith.constant 0 : index
    %c0_10 = arith.constant 0 : index
    %11 = vector.load %arg5[%c0_9, %c0_10] : memref<1x128xf32, #tpu.memory_space<vmem>>, vector<1x128xf32>
    %12 = vector.broadcast %11 : vector<1x128xf32> to vector<1024x128xf32>
    %13 = arith.addf %10, %12 : vector<1024x128xf32>
    %cst_11 = arith.constant 0.000000e+00 : f32
    %14 = vector.broadcast %cst_11 : f32 to vector<1024x128xf32>
    %15 = arith.maximumf %13, %14 : vector<1024x128xf32>
    %16 = arith.truncf %15 : vector<1024x128xf32> to vector<1024x128xbf16>
    %c0_12 = arith.constant 0 : index
    %c0_13 = arith.constant 0 : index
    %17 = vector.load %arg6[%c0_12, %c0_13] : memref<128x4xbf16, #tpu.memory_space<vmem>>, vector<128x4xbf16>
    %cst_14 = arith.constant dense<0.000000e+00> : vector<1024x4xf32>
    %18 = tpu.matmul %16, %17, %cst_14 {dimension_numbers = #tpu.dot_dimension_numbers<[1], [0], [0], [1], [0, 0, 1, 1], [], []>} : vector<1024x128xbf16>, vector<128x4xbf16>, vector<1024x4xf32> -> vector<1024x4xf32>
    %c0_15 = arith.constant 0 : index
    %c0_16 = arith.constant 0 : index
    %19 = vector.load %arg7[%c0_15, %c0_16] : memref<1x4xf32, #tpu.memory_space<vmem>>, vector<1x4xf32>
    %20 = vector.broadcast %19 : vector<1x4xf32> to vector<1024x4xf32>
    %21 = arith.addf %18, %20 : vector<1024x4xf32>
    %c0_17 = arith.constant 0 : index
    %c0_18 = arith.constant 0 : index
    %22 = vector.load %arg8[%c0_17, %c0_18] : memref<1024x4xf32, #tpu.memory_space<vmem>>, vector<1024x4xf32>
    tpu.vector_store %arg8[%c0_17, %c0_18], %21 {strides = array<i32>} : memref<1024x4xf32, #tpu.memory_space<vmem>>, vector<1024x4xf32>,
    return
  }
  func.func @transform_0(%arg0: i32) -> (i32, i32) {
    %c0_i32 = arith.constant 0 : i32
    %c0_i32_0 = arith.constant 0 : i32
    return %arg0, %c0_i32 : i32, i32
  }
  func.func @transform_1(%arg0: i32) -> (i32, i32) {
    %c0_i32 = arith.constant 0 : i32
    %c0_i32_0 = arith.constant 0 : i32
    %c0_i32_1 = arith.constant 0 : i32
    return %c0_i32, %c0_i32_0 : i32, i32
  }
  func.func @transform_2(%arg0: i32) -> (i32, i32) {
    %c0_i32 = arith.constant 0 : i32
    %c0_i32_0 = arith.constant 0 : i32
    %c0_i32_1 = arith.constant 0 : i32
    return %c0_i32, %c0_i32_0 : i32, i32
  }
  func.func @transform_3(%arg0: i32) -> (i32, i32) {
    %c0_i32 = arith.constant 0 : i32
    %c0_i32_0 = arith.constant 0 : i32
    %c0_i32_1 = arith.constant 0 : i32
    return %c0_i32, %c0_i32_0 : i32, i32
  }
  func.func @transform_4(%arg0: i32) -> (i32, i32) {
    %c0_i32 = arith.constant 0 : i32
    %c0_i32_0 = arith.constant 0 : i32
    %c0_i32_1 = arith.constant 0 : i32
    return %c0_i32, %c0_i32_0 : i32, i32
  }
  func.func @transform_5(%arg0: i32) -> (i32, i32) {
    %c0_i32 = arith.constant 0 : i32
    %c0_i32_0 = arith.constant 0 : i32
    %c0_i32_1 = arith.constant 0 : i32
    return %c0_i32, %c0_i32_0 : i32, i32
  }
  func.func @transform_6(%arg0: i32) -> (i32, i32) {
    %c0_i32 = arith.constant 0 : i32
    %c0_i32_0 = arith.constant 0 : i32
    %c0_i32_1 = arith.constant 0 : i32
    return %c0_i32, %c0_i32_0 : i32, i32
  }
  func.func @transform_7(%arg0: i32) -> (i32, i32) {
    %c0_i32 = arith.constant 0 : i32
    %c0_i32_0 = arith.constant 0 : i32
    return %arg0, %c0_i32 : i32, i32
  }
}

</mosaic_0001>

<bundles_post_ra>
// kernel: tpu_custom_call.1
= control target key start
LH: loop header
LB: loop body
LE: loop exit
PB: predicated region body
PF: predicated region fallthrough
CT: control target
= control target key end

     0   :  { %s4227_s24 = smov 0   ;;  %s5291_s0 = inlined_call_operand.vmem [shape: bf16[2048,32], index: 0, kind: input, shape index: {}]   ;;  %s5292_s1 = inlined_call_operand.vmem [shape: bf16[32,128], index: 1, kind: input, shape index: {}]   ;;  %s5293_s2 = inlined_call_operand.vmem [shape: f32[1,128], index: 2, kind: input, shape index: {}]   ;;  %s5294_s3 = inlined_call_operand.vmem [shape: bf16[128,128], index: 3, kind: input, shape index: {}]   ;;  %s5295_s4 = inlined_call_operand.vmem [shape: f32[1,128], index: 4, kind: input, shape index: {}]   ;;  %s5296_s5 = inlined_call_operand.vmem [shape: bf16[128,4], index: 5, kind: input, shape index: {}]   ;;  %s5297_s6 = inlined_call_operand.vmem [shape: f32[1,4], index: 6, kind: input, shape index: {}]   ;;  %s5298_s7 = inlined_call_operand.vmem [shape: f32[2048,4], index: 7, kind: output, shape index: {}]  }
   0x1 LB: > { %s3293_s25 = sadd.s32 4294967295, %s4185_s24   ;;  %p3297_p0 = scmp.ge.s32.totalorder %s4185_s24, 1  ;;  %s4185_s24 = sphi %s4227_s24, %s17_s24  }
   0x2   : > { %p238_p1 = scmp.lt.s32.totalorder %s4185_s24, 3 }
   0x4   : > { %p239_p2 = pnand %p3297_p0, %p238_p1 }
   0x5   : > { %s3298_s28 = sshll.u32 (!%p239_p2), %s3293_s25, 7 }
   0x6   : > { %242 = sbr.rel (%p239_p2) target bundleno = 882 (0x372), region = 48  ;;  %p271_p3 = scmp.lt.s32.totalorder (!%p239_p2), %s3298_s28, 255 }
   0xb   : > { %v4095_v0 = vld [vmem:[%s5292_s1 + $0x8] sm:$0xff]   ;;  %v4096_v1 = vld [vmem:[%s5292_s1] sm:$0xff]   ;;  %s5300_s28 = smov (!%p271_p3, %s3298_s28), 255  ;;  %v4119_v2 = vld [vmem:[%s5294_s3 + $0x38] sm:$0xff]   ;;  %vm754_vm0 = vcmask 261120   ;;  %vm3108_vm1 = vcmask 31744  }
   0xc   : > { %3663 = vmatprep.subr.bf16.mxu0 %v4095_v0  ;;  %4083 = vmatprep.subr.bf16.mxu1 %v4095_v0  ;;  %s3299_s10 = sshll.u32 %s5300_s28, 2  ;;  %v4128_v11 = vld [vmem:[%s5294_s3 + $0x30] sm:$0xff]   ;;  %v4137_v16 = vld [vmem:[%s5294_s3 + $0x28] sm:$0xff]   ;;  %v4146_v19 = vld [vmem:[%s5294_s3 + $0x20] sm:$0xff]   ;;  %s3301_s8 = sshll.u32 %s5300_s28, 3 }
   0xd   : > { %3664 = vmatpush3.bf16.msra.mxu0 %v4095_v0  ;;  %4085 = vmatpush3.bf16.msra.mxu1 %v4095_v0  ;;  %s4250_s13 = scalar_lea.vmem %s5291_s0, %s3299_s10  ;;  %v4151_v22 = vld [vmem:[%s5294_s3 + $0x18] sm:$0xff]   ;;  %v4156_v33 = vld [vmem:[%s5294_s3 + $0x10] sm:$0xff]   ;;  %v4161_v37 = vld [vmem:[%s5294_s3 + $0x8] sm:$0xff]  }
   0xe   : > { %3665 = vmatprep.subr.bf16.mxu0 %v4096_v1  ;;  %4084 = vmatprep.subr.bf16.mxu1 %v4096_v1  ;;  %v4097_v3 = vld [vmem:[%s4250_s13] sm:$0xff]   ;;  %v4098_v4 = vld [vmem:[%s4250_s13 + $0x8] sm:$0xff]   ;;  %v4099_v5 = vld [vmem:[%s4250_s13 + $0x10] sm:$0xff]  }
   0xf   : > { %3667 = vmatprep.mubr.msk.bf16.mxu0 %vm754_vm0, %v4097_v3  ;;  %v4100_v6 = vld [vmem:[%s4250_s13 + $0x18] sm:$0xff]   ;;  %v4101_v7 = vld [vmem:[%s4250_s13 + $0x20] sm:$0xff]   ;;  %v4102_v8 = vld [vmem:[%s4250_s13 + $0x28] sm:$0xff]  }
  0x10   : > { %v4103_v9 = vld [vmem:[%s4250_s13 + $0x30] sm:$0xff]   ;;  %v4116_v10 = vld [vmem:[%s4250_s13 + $0x100] sm:$0xff]   ;;  %v4118_v12 = vld [vmem:[%s4250_s13 + $0x108] sm:$0xff]  }
  0x11   : > { %3666 = vmatpush3.bf16.msra.mxu0 %v4096_v1  ;;  %4086 = vmatpush3.bf16.msra.mxu1 %v4096_v1  ;;  %v4104_v13 = vld [vmem:[%s4250_s13 + $0x38] sm:$0xff]   ;;  %v4121_v14 = vld [vmem:[%s4250_s13 + $0x110] sm:$0xff]   ;;  %v4105_v15 = vld [vmem:[%s4250_s13 + $0x40] sm:$0xff]  }
  0x12   : > { %3795 = vmatprep.subr.bf16.mxu1 %v4119_v2  ;;  %3731 = vmatprep.mubr.msk.bf16.mxu1 %vm754_vm0, %v4116_v10  ;;  %v4123_v17 = vld [vmem:[%s4250_s13 + $0x118] sm:$0xff]   ;;  %v4125_v18 = vld [vmem:[%s4250_s13 + $0x120] sm:$0xff]   ;;  %v4106_v20 = vld [vmem:[%s4250_s13 + $0x48] sm:$0xff]  }
  0x13   : > { %v4107_v21 = vld [vmem:[%s4250_s13 + $0x50] sm:$0xff]   ;;  %v4127_v23 = vld [vmem:[%s4250_s13 + $0x128] sm:$0xff]   ;;  %v4108_v25 = vld [vmem:[%s4250_s13 + $0x58] sm:$0xff]  }
  0x14   : > { %3668 = vmatmul.mubr.msk.bf16.vlgmr.msra.gmra.mxu0 %vm754_vm0, %v4098_v4  ;;  %3732 = vmatmul.mubr.msk.bf16.vlgmr.msra.gmra.mxu1 %vm754_vm0, %v4118_v12  ;;  %v4130_v24 = vld [vmem:[%s4250_s13 + $0x130] sm:$0xff]   ;;  %v4109_v26 = vld [vmem:[%s4250_s13 + $0x60] sm:$0xff]   ;;  %v4132_v27 = vld [vmem:[%s4250_s13 + $0x138] sm:$0xff]  }
  0x15   : > { %3671 = vmatprep.mubr.msk.bf16.mxu0 %vm754_vm0, %v4099_v5  ;;  %3796 = vmatpush3.bf16.msra.mxu1 %v4119_v2  ;;  %v4134_v28 = vld [vmem:[%s4250_s13 + $0x140] sm:$0xff]   ;;  %v4110_v29 = vld [vmem:[%s4250_s13 + $0x68] sm:$0xff]   ;;  %v4111_v30 = vld [vmem:[%s4250_s13 + $0x70] sm:$0xff]  }
  0x16   : > { %3735 = vmatprep.mubr.msk.bf16.mxu1 %vm754_vm0, %v4121_v14  ;;  %3797 = vmatprep.subr.bf16.mxu1 %v4128_v11  ;;  %v4136_v31 = vld [vmem:[%s4250_s13 + $0x148] sm:$0xff]   ;;  %v4139_v32 = vld [vmem:[%s4250_s13 + $0x150] sm:$0xff]   ;;  %v4112_v34 = vld [vmem:[%s4250_s13 + $0x78] sm:$0xff]  }
  0x17   : > { %v4113_v35 = vld [vmem:[%s4250_s13 + $0x80] sm:$0xff]   ;;  %v4141_v36 = vld [vmem:[%s4250_s13 + $0x158] sm:$0xff]   ;;  %v4114_v39 = vld [vmem:[%s4250_s13 + $0x88] sm:$0xff]  }
  0x18   : > { %v4143_v38 = vld [vmem:[%s4250_s13 + $0x160] sm:$0xff]   ;;  %v4115_v40 = vld [vmem:[%s4250_s13 + $0x90] sm:$0xff]   ;;  %v4145_v42 = vld [vmem:[%s4250_s13 + $0x168] sm:$0xff]  }
  0x19   : > { %3798 = vmatpush3.bf16.msra.mxu1 %v4128_v11  ;;  %v4166_v41 = vld [vmem:[%s5294_s3] sm:$0xff]   ;;  %v4147_v43 = vld [vmem:[%s4250_s13 + $0x170] sm:$0xff]   ;;  %v4117_v44 = vld [vmem:[%s4250_s13 + $0x98] sm:$0xff]  }
  0x1a   : > { %3799 = vmatprep.subr.bf16.mxu1 %v4137_v16  ;;  %v4120_v45 = vld [vmem:[%s4250_s13 + $0xa0] sm:$0xff]   ;;  %v4148_v46 = vld [vmem:[%s4250_s13 + $0x178] sm:$0xff]   ;;  %v4122_v48 = vld [vmem:[%s4250_s13 + $0xa8] sm:$0xff]  }
  0x1b   : > { %v4149_v47 = vld [vmem:[%s4250_s13 + $0x180] sm:$0xff]   ;;  %v4124_v49 = vld [vmem:[%s4250_s13 + $0xb0] sm:$0xff]   ;;  %v4150_v50 = vld [vmem:[%s4250_s13 + $0x188] sm:$0xff]  }
  0x1c   : > { %3672 = vmatmul.mubr.msk.bf16.gmra.mxu0 %vm754_vm0, %v4100_v6  ;;  %3736 = vmatmul.mubr.msk.bf16.gmra.mxu1 %vm754_vm0, %v4123_v17  ;;  %v4152_v51 = vld [vmem:[%s4250_s13 + $0x190] sm:$0xff]   ;;  %v4126_v52 = vld [vmem:[%s4250_s13 + $0xb8] sm:$0xff]   ;;  %v4129_v53 = vld [vmem:[%s4250_s13 + $0xc0] sm:$0xff]  }
  0x1d   : > { %3675 = vmatprep.mubr.msk.bf16.mxu0 %vm754_vm0, %v4101_v7  ;;  %3739 = vmatprep.mubr.msk.bf16.mxu1 %vm754_vm0, %v4125_v18  ;;  %v4153_v54 = vld [vmem:[%s4250_s13 + $0x198] sm:$0xff]   ;;  %v4154_v55 = vld [vmem:[%s4250_s13 + $0x1a0] sm:$0xff]   ;;  %v4131_v56 = vld [vmem:[%s4250_s13 + $0xc8] sm:$0xff]  }
  0x1e   : > { %3800 = vmatpush3.bf16.msra.mxu1 %v4137_v16  ;;  %v4133_v57 = vld [vmem:[%s4250_s13 + $0xd0] sm:$0xff]   ;;  %v4155_v58 = vld [vmem:[%s4250_s13 + $0x1a8] sm:$0xff]   ;;  %v4135_v60 = vld [vmem:[%s4250_s13 + $0xd8] sm:$0xff]  }
  0x1f   : > { %3801 = vmatprep.subr.bf16.mxu1 %v4146_v19  ;;  %v4157_v59 = vld [vmem:[%s4250_s13 + $0x1b0] sm:$0xff]   ;;  %v4138_v61 = vld [vmem:[%s4250_s13 + $0xe0] sm:$0xff]   ;;  %v4158_v62 = vld [vmem:[%s4250_s13 + $0x1b8] sm:$0xff]  }
  0x20   : > { %v4159_v63 = vld [vmem:[%s4250_s13 + $0x1c0] sm:$0xff]   ;;  %v4140_v0 = vld [vmem:[%s4250_s13 + $0xe8] sm:$0xff]   ;;  %v4142_v1 = vld [vmem:[%s4250_s13 + $0xf0] sm:$0xff]  }
  0x21   : > { %v4160_v2 = vld [vmem:[%s4250_s13 + $0x1c8] sm:$0xff]   ;;  %v4162_v3 = vld [vmem:[%s4250_s13 + $0x1d0] sm:$0xff]   ;;  %v4144_v4 = vld [vmem:[%s4250_s13 + $0xf8] sm:$0xff]  }
  0x22   : > { %3802 = vmatpush3.bf16.msra.mxu1 %v4146_v19  ;;  %v4163_v5 = vld [vmem:[%s4250_s13 + $0x1d8] sm:$0xff]   ;;  %v4164_v6 = vld [vmem:[%s4250_s13 + $0x1e0] sm:$0xff]   ;;  %v4165_v7 = vld [vmem:[%s4250_s13 + $0x1e8] sm:$0xff]  }
  0x23   : > { %3803 = vmatprep.subr.bf16.mxu1 %v4151_v22  ;;  %v4169_v10 = vld [vmem:[%s5296_s5 + $0x38] sm:$0xff]   ;;  %v4170_v11 = vld [vmem:[%s5296_s5 + $0x30] sm:$0xff]   ;;  %v4171_v12 = vld [vmem:[%s5296_s5 + $0x28] sm:$0xff]  }
  0x24   : > { %3676 = vmatmul.mubr.msk.bf16.gmra.mxu0 %vm754_vm0, %v4102_v8  ;;  %3740 = vmatmul.mubr.msk.bf16.gmra.mxu1 %vm754_vm0, %v4127_v23  ;;  %v4167_v8 = vld [vmem:[%s4250_s13 + $0x1f0] sm:$0xff]  }
  0x25   : > { %3679 = vmatprep.mubr.msk.bf16.mxu0 %vm754_vm0, %v4103_v9  ;;  %3743 = vmatprep.mubr.msk.bf16.mxu1 %vm754_vm0, %v4130_v24  ;;  %v4168_v9 = vld [vmem:[%s4250_s13 + $0x1f8] sm:$0xff]   ;;  %s4872_s13 = scalar_lea.vmem %s5298_s7, %s3301_s8 }
  0x26   : > { %3804 = vmatpush3.bf16.msra.mxu1 %v4151_v22  ;;  %3939 = vmatprep.subr.bf16.mxu0 %v4169_v10  ;;  %v4172_v22 = vld [vmem:[%s5296_s5 + $0x20] sm:$0xff]  }
  0x27   : > { %3805 = vmatprep.subr.bf16.mxu1 %v4156_v33  ;;  %3940 = vmatpush3.bf16.msra.mxu0 %v4169_v10 }
  0x28   : > { %3941 = vmatprep.subr.bf16.mxu0 %v4170_v11 }
  0x2a   : > { %3806 = vmatpush3.bf16.msra.mxu1 %v4156_v33 }
  0x2b   : > { %3807 = vmatprep.subr.bf16.mxu1 %v4161_v37  ;;  %3942 = vmatpush3.bf16.msra.mxu0 %v4170_v11 }
  0x2c   : > { %3680 = vmatmul.mubr.msk.bf16.gmra.mxu0 %vm754_vm0, %v4104_v13  ;;  %3744 = vmatmul.mubr.msk.bf16.gmra.mxu1 %vm754_vm0, %v4132_v27 }
  0x2d   : > { %3683 = vmatprep.mubr.msk.bf16.mxu0 %vm754_vm0, %v4105_v15  ;;  %3747 = vmatprep.mubr.msk.bf16.mxu1 %vm754_vm0, %v4134_v28  ;;  %v4413_v15 = vld [vmem:[%s5293_s2] ss:$0 sm:$0xff] }
  0x2e   : > { %3808 = vmatpush3.bf16.msra.mxu1 %v4161_v37  ;;  %3943 = vmatprep.subr.bf16.mxu0 %v4171_v12 }
  0x2f   : > { %3809 = vmatprep.subr.bf16.mxu1 %v4166_v41  ;;  %3944 = vmatpush3.bf16.msra.mxu0 %v4171_v12 }
  0x30   : > { %3945 = vmatprep.subr.bf16.mxu0 %v4172_v22 }
  0x32   : > { %3810 = vmatpush3.bf16.msra.mxu1 %v4166_v41 }
  0x33   : > { %3946 = vmatpush3.bf16.msra.mxu0 %v4172_v22 }
  0x34   : > { %3684 = vmatmul.mubr.msk.bf16.gmra.mxu0 %vm754_vm0, %v4106_v20  ;;  %3748 = vmatmul.mubr.msk.bf16.gmra.mxu1 %vm754_vm0, %v4136_v31 }
  0x35   : > { %3687 = vmatprep.mubr.msk.bf16.mxu0 %vm754_vm0, %v4107_v21  ;;  %3751 = vmatprep.mubr.msk.bf16.mxu1 %vm754_vm0, %v4139_v32 }
  0x3c   : > { %3688 = vmatmul.mubr.msk.bf16.gmra.mxu0 %vm754_vm0, %v4108_v25  ;;  %3752 = vmatmul.mubr.msk.bf16.gmra.mxu1 %vm754_vm0, %v4141_v36 }
  0x3d   : > { %3691 = vmatprep.mubr.msk.bf16.mxu0 %vm754_vm0, %v4109_v26  ;;  %3755 = vmatprep.mubr.msk.bf16.mxu1 %vm754_vm0, %v4143_v38 }
  0x44   : > { %3692 = vmatmul.mubr.msk.bf16.gmra.mxu0 %vm754_vm0, %v4110_v29  ;;  %3756 = vmatmul.mubr.msk.bf16.gmra.mxu1 %vm754_vm0, %v4145_v42 }
  0x45   : > { %3695 = vmatprep.mubr.msk.bf16.mxu0 %vm754_vm0, %v4111_v30  ;;  %3759 = vmatprep.mubr.msk.bf16.mxu1 %vm754_vm0, %v4147_v43 }
  0x4c   : > { %3696 = vmatmul.mubr.msk.bf16.gmra.mxu0 %vm754_vm0, %v4112_v34  ;;  %3760 = vmatmul.mubr.msk.bf16.gmra.mxu1 %vm754_vm0, %v4148_v46 }
  0x4d   : > { %3699 = vmatprep.mubr.msk.bf16.mxu0 %vm754_vm0, %v4113_v35  ;;  %3763 = vmatprep.mubr.msk.bf16.mxu1 %vm754_vm0, %v4149_v47 }
  0x54   : > { %3700 = vmatmul.mubr.msk.bf16.gmra.mxu0 %vm754_vm0, %v4114_v39  ;;  %3764 = vmatmul.mubr.msk.bf16.gmra.mxu1 %vm754_vm0, %v4150_v50 }
  0x55   : > { %3703 = vmatprep.mubr.msk.bf16.mxu0 %vm754_vm0, %v4115_v40  ;;  %3767 = vmatprep.mubr.msk.bf16.mxu1 %vm754_vm0, %v4152_v51 }
  0x5c   : > { %3704 = vmatmul.mubr.msk.bf16.gmra.mxu0 %vm754_vm0, %v4117_v44  ;;  %3768 = vmatmul.mubr.msk.bf16.gmra.mxu1 %vm754_vm0, %v4153_v54 }
  0x5d   : > { %3707 = vmatprep.mubr.msk.bf16.mxu0 %vm754_vm0, %v4120_v45  ;;  %3771 = vmatprep.mubr.msk.bf16.mxu1 %vm754_vm0, %v4154_v55 }
  0x64   : > { %3708 = vmatmul.mubr.msk.bf16.gmra.mxu0 %vm754_vm0, %v4122_v48  ;;  %3772 = vmatmul.mubr.msk.bf16.gmra.mxu1 %vm754_vm0, %v4155_v58 }
  0x65   : > { %3711 = vmatprep.mubr.msk.bf16.mxu0 %vm754_vm0, %v4124_v49  ;;  %3775 = vmatprep.mubr.msk.bf16.mxu1 %vm754_vm0, %v4157_v59 }
  0x6c   : > { %3712 = vmatmul.mubr.msk.bf16.gmra.mxu0 %vm754_vm0, %v4126_v52  ;;  %3776 = vmatmul.mubr.msk.bf16.gmra.mxu1 %vm754_vm0, %v4158_v62 }
  0x6d   : > { %3715 = vmatprep.mubr.msk.bf16.mxu0 %vm754_vm0, %v4129_v53  ;;  %3779 = vmatprep.mubr.msk.bf16.mxu1 %vm754_vm0, %v4159_v63  ;;  %v4173_v53 = vld [vmem:[%s5296_s5 + $0x18] sm:$0xff]  }
  0x6e   : > { %3947 = vmatprep.subr.bf16.mxu0 %v4173_v53 }
  0x6f   : > { %3948 = vmatpush3.bf16.msra.mxu0 %v4173_v53 }
  0x74   : > { %3716 = vmatmul.mubr.msk.bf16.gmra.mxu0 %vm754_vm0, %v4131_v56  ;;  %3780 = vmatmul.mubr.msk.bf16.gmra.mxu1 %vm754_vm0, %v4160_v2 }
  0x75   : > { %3719 = vmatprep.mubr.msk.bf16.mxu0 %vm754_vm0, %v4133_v57  ;;  %3783 = vmatprep.mubr.msk.bf16.mxu1 %vm754_vm0, %v4162_v3 }
  0x7c   : > { %3720 = vmatmul.mubr.msk.bf16.gmra.mxu0 %vm754_vm0, %v4135_v60  ;;  %3784 = vmatmul.mubr.msk.bf16.gmra.mxu1 %vm754_vm0, %v4163_v5 }
  0x7d   : > { %3723 = vmatprep.mubr.msk.bf16.mxu0 %vm754_vm0, %v4138_v61  ;;  %3787 = vmatprep.mubr.msk.bf16.mxu1 %vm754_vm0, %v4164_v6 }
  0x84   : > { %3724 = vmatmul.mubr.msk.bf16.gmra.mxu0 %vm754_vm0, %v4140_v0  ;;  %3788 = vmatmul.mubr.msk.bf16.gmra.mxu1 %vm754_vm0, %v4165_v7 }
  0x85   : > { %3727 = vmatprep.mubr.msk.bf16.mxu0 %vm754_vm0, %v4142_v1  ;;  %3791 = vmatprep.mubr.msk.bf16.mxu1 %vm754_vm0, %v4167_v8 }
  0x8c   : > { %3728 = vmatmul.mubr.msk.bf16.gmra.mxu0 %vm754_vm0, %v4144_v4  ;;  %3792 = vmatmul.mubr.msk.bf16.gmra.mxu1 %vm754_vm0, %v4168_v9 }
  0xd4   : > { %v3669_v13 = vpop.f32.mrf.mxu0  ;;  %v4426_v46 = vpop.f32.mrf.mxu1 }
  0xd5   : > { %v990_v19 = vadd.f32 %v3669_v13, %v4413_v15 }
  0xd6   : > { %v981_v14 = vpop.f32.mrf.mxu0  ;;  %v4431_v51 = vpop.f32.mrf.mxu1 }
  0xd7   : > { %v982_v17 = vadd.f32 %v4413_v15, %v981_v14  ;;  %v1494_v27 = vmax.f32 %v990_v19, 0.0 }
  0xd8   : > { %v3670_v16 = vpop.f32.mrf.mxu0  ;;  %v4437_v56 = vpop.f32.mrf.mxu1 }
  0xd9   : > { %v993_v18 = vadd.f32 %v3670_v16, %v4413_v15  ;;  %v1492_v25 = vmax.f32 %v982_v17, 0.0 }
  0xda   : > { %v984_v20 = vpop.f32.mrf.mxu0  ;;  %v4439_v61 = vpop.f32.mrf.mxu1 }
  0xdb   : > { %v985_v21 = vadd.f32 %v4413_v15, %v984_v20  ;;  %v1495_v23 = vmax.f32 %v993_v18, 0.0 }
  0xdc   : > { %v3673_v24 = vpop.f32.mrf.mxu0  ;;  %v4441_v1 = vpop.f32.mrf.mxu1 }
  0xdd   : > { %v1493_v26 = vmax.f32 %v985_v21, 0.0  ;;  %v1621_v30 = vpack.c.bf16 %v1495_v23, %v1494_v27  ;;  %v1006_v34 = vadd.f32 %v3673_v24, %v4413_v15  ;;  %v4174_v27 = vld [vmem:[%s5296_s5 + $0x10] sm:$0xff]  }
  0xde   : > { %v997_v28 = vpop.f32.mrf.mxu0  ;;  %v4446_v6 = vpop.f32.mrf.mxu1  ;;  %3949 = vmatprep.subr.bf16.mxu0 %v4174_v27 }
  0xdf   : > { %v1620_v29 = vpack.c.bf16 %v1493_v26, %v1492_v25  ;;  %v998_v32 = vadd.f32 %v4413_v15, %v997_v28  ;;  %v1498_v41 = vmax.f32 %v1006_v34, 0.0  ;;  %3950 = vmatpush3.bf16.msra.mxu0 %v4174_v27 }
  0xe0   : > { %v3674_v31 = vpop.f32.mrf.mxu0  ;;  %v4449_v10 = vpop.f32.mrf.mxu1 }
  0xe1   : > { %v1009_v33 = vadd.f32 %v3674_v31, %v4413_v15  ;;  %3811 = vmatprep.mubr.bf16.mxu1 %v1620_v29  ;;  %v1496_v39 = vmax.f32 %v998_v32, 0.0 }
  0xe2   : > { %v1000_v35 = vpop.f32.mrf.mxu0  ;;  %3812 = vmatmul.mubr.bf16.vlgmr.msra.gmra.mxu1 %v1621_v30  ;;  %v4451_v16 = vpop.f32.mrf.mxu1 }
  0xe3   : > { %v1001_v36 = vadd.f32 %v4413_v15, %v1000_v35  ;;  %v1499_v37 = vmax.f32 %v1009_v33, 0.0 }
  0xe4   : > { %v3677_v38 = vpop.f32.mrf.mxu0  ;;  %v4453_v20 = vpop.f32.mrf.mxu1 }
  0xe5   : > { %v1497_v40 = vmax.f32 %v1001_v36, 0.0  ;;  %v1623_v44 = vpack.c.bf16 %v1499_v37, %v1498_v41  ;;  %v1022_v49 = vadd.f32 %v3677_v38, %v4413_v15 }
  0xe6   : > { %v1013_v42 = vpop.f32.mrf.mxu0  ;;  %v4458_v25 = vpop.f32.mrf.mxu1 }
  0xe7   : > { %v1622_v43 = vpack.c.bf16 %v1497_v40, %v1496_v39  ;;  %v1014_v47 = vadd.f32 %v4413_v15, %v1013_v42  ;;  %v1502_v59 = vmax.f32 %v1022_v49, 0.0 }
  0xe8   : > { %v3678_v45 = vpop.f32.mrf.mxu0  ;;  %v4464_v30 = vpop.f32.mrf.mxu1 }
  0xe9   : > { %v1025_v48 = vadd.f32 %v3678_v45, %v4413_v15  ;;  %3815 = vmatprep.mubr.bf16.mxu1 %v1622_v43  ;;  %v1500_v57 = vmax.f32 %v1014_v47, 0.0 }
  0xea   : > { %v1016_v50 = vpop.f32.mrf.mxu0  ;;  %3816 = vmatmul.mubr.bf16.gmra.mxu1 %v1623_v44  ;;  %v4466_v35 = vpop.f32.mrf.mxu1 }
  0xeb   : > { %v1017_v52 = vadd.f32 %v4413_v15, %v1016_v50  ;;  %v1503_v54 = vmax.f32 %v1025_v48, 0.0 }
  0xec   : > { %v3681_v55 = vpop.f32.mrf.mxu0  ;;  %v4468_v39 = vpop.f32.mrf.mxu1 }
  0xed   : > { %v1501_v58 = vmax.f32 %v1017_v52, 0.0  ;;  %v1625_v63 = vpack.c.bf16 %v1503_v54, %v1502_v59  ;;  %v1038_v4 = vadd.f32 %v3681_v55, %v4413_v15 }
  0xee   : > { %v1029_v60 = vpop.f32.mrf.mxu0  ;;  %v4473_v44 = vpop.f32.mrf.mxu1 }
  0xef   : > { %v1624_v62 = vpack.c.bf16 %v1501_v58, %v1500_v57  ;;  %v1030_v2 = vadd.f32 %v4413_v15, %v1029_v60  ;;  %v1506_v13 = vmax.f32 %v1038_v4, 0.0 }
  0xf0   : > { %v3682_v0 = vpop.f32.mrf.mxu0  ;;  %v4476_v49 = vpop.f32.mrf.mxu1 }
  0xf1   : > { %v1041_v3 = vadd.f32 %v3682_v0, %v4413_v15  ;;  %3819 = vmatprep.mubr.bf16.mxu1 %v1624_v62  ;;  %v1504_v11 = vmax.f32 %v1030_v2, 0.0 }
  0xf2   : > { %v1032_v5 = vpop.f32.mrf.mxu0  ;;  %3820 = vmatmul.mubr.bf16.gmra.mxu1 %v1625_v63  ;;  %v4478_v55 = vpop.f32.mrf.mxu1 }
  0xf3   : > { %v1033_v7 = vadd.f32 %v4413_v15, %v1032_v5  ;;  %v1507_v8 = vmax.f32 %v1041_v3, 0.0  ;;  %v4175_v5 = vld [vmem:[%s5296_s5 + $0x8] sm:$0xff]  }
  0xf4   : > { %v3685_v9 = vpop.f32.mrf.mxu0  ;;  %v4480_v60 = vpop.f32.mrf.mxu1  ;;  %3951 = vmatprep.subr.bf16.mxu0 %v4175_v5 }
  0xf5   : > { %v1505_v12 = vmax.f32 %v1033_v7, 0.0  ;;  %v1627_v18 = vpack.c.bf16 %v1507_v8, %v1506_v13  ;;  %v1054_v23 = vadd.f32 %v3685_v9, %v4413_v15  ;;  %3952 = vmatpush3.bf16.msra.mxu0 %v4175_v5 }
  0xf6   : > { %v1045_v14 = vpop.f32.mrf.mxu0  ;;  %v4485_v3 = vpop.f32.mrf.mxu1 }
  0xf7   : > { %v1626_v17 = vpack.c.bf16 %v1505_v12, %v1504_v11  ;;  %v1046_v21 = vadd.f32 %v4413_v15, %v1045_v14  ;;  %v1510_v33 = vmax.f32 %v1054_v23, 0.0 }
  0xf8   : > { %v3686_v19 = vpop.f32.mrf.mxu0  ;;  %v4491_v9 = vpop.f32.mrf.mxu1 }
  0xf9   : > { %v1057_v22 = vadd.f32 %v3686_v19, %v4413_v15  ;;  %3823 = vmatprep.mubr.bf16.mxu1 %v1626_v17  ;;  %v1508_v31 = vmax.f32 %v1046_v21, 0.0 }
  0xfa   : > { %v1048_v24 = vpop.f32.mrf.mxu0  ;;  %3824 = vmatmul.mubr.bf16.gmra.mxu1 %v1627_v18  ;;  %v4493_v17 = vpop.f32.mrf.mxu1 }
  0xfb   : > { %v1049_v26 = vadd.f32 %v4413_v15, %v1048_v24  ;;  %v1511_v28 = vmax.f32 %v1057_v22, 0.0 }
  0xfc   : > { %v3689_v29 = vpop.f32.mrf.mxu0  ;;  %v4495_v22 = vpop.f32.mrf.mxu1 }
  0xfd   : > { %v1509_v32 = vmax.f32 %v1049_v26, 0.0  ;;  %v1629_v37 = vpack.c.bf16 %v1511_v28, %v1510_v33  ;;  %v1070_v42 = vadd.f32 %v3689_v29, %v4413_v15 }
  0xfe   : > { %v1061_v34 = vpop.f32.mrf.mxu0  ;;  %v4500_v28 = vpop.f32.mrf.mxu1 }
  0xff   : > { %v1628_v36 = vpack.c.bf16 %v1509_v32, %v1508_v31  ;;  %v1062_v40 = vadd.f32 %v4413_v15, %v1061_v34  ;;  %v1514_v53 = vmax.f32 %v1070_v42, 0.0 }
 0x100   : > { %v3690_v38 = vpop.f32.mrf.mxu0  ;;  %v4503_v33 = vpop.f32.mrf.mxu1 }
 0x101   : > { %v1073_v41 = vadd.f32 %v3690_v38, %v4413_v15  ;;  %3827 = vmatprep.mubr.bf16.mxu1 %v1628_v36  ;;  %v1512_v50 = vmax.f32 %v1062_v40, 0.0 }
 0x102   : > { %v1064_v43 = vpop.f32.mrf.mxu0  ;;  %3828 = vmatmul.mubr.bf16.gmra.mxu1 %v1629_v37  ;;  %v4505_v40 = vpop.f32.mrf.mxu1 }
 0x103   : > { %v1065_v45 = vadd.f32 %v4413_v15, %v1064_v43  ;;  %v1515_v47 = vmax.f32 %v1073_v41, 0.0 }
 0x104   : > { %v3693_v48 = vpop.f32.mrf.mxu0 }
 0x105   : > { %v1513_v52 = vmax.f32 %v1065_v45, 0.0  ;;  %v1631_v58 = vpack.c.bf16 %v1515_v47, %v1514_v53  ;;  %v1086_v0 = vadd.f32 %v3693_v48, %v4413_v15  ;;  %v4507_v45 = vpop.f32.mrf.mxu1 }
 0x106   : > { %v1077_v54 = vpop.f32.mrf.mxu0 }
 0x107   : > { %v1630_v57 = vpack.c.bf16 %v1513_v52, %v1512_v50  ;;  %v1078_v62 = vadd.f32 %v4413_v15, %v1077_v54  ;;  %v1518_v13 = vmax.f32 %v1086_v0, 0.0  ;;  %v4512_v53 = vpop.f32.mrf.mxu1 }
 0x108   : > { %v3694_v59 = vpop.f32.mrf.mxu0 }
 0x109   : > { %v1089_v63 = vadd.f32 %v3694_v59, %v4413_v15  ;;  %3831 = vmatprep.mubr.bf16.mxu1 %v1630_v57  ;;  %v1516_v11 = vmax.f32 %v1078_v62, 0.0  ;;  %v4176_v57 = vld [vmem:[%s5296_s5] sm:$0xff]   ;;  %v4518_v62 = vpop.f32.mrf.mxu1 }
 0x10a   : > { %v1080_v2 = vpop.f32.mrf.mxu0  ;;  %3832 = vmatmul.mubr.bf16.gmra.mxu1 %v1631_v58  ;;  %3953 = vmatprep.subr.bf16.mxu0 %v4176_v57 }
 0x10b   : > { %v1081_v4 = vadd.f32 %v4413_v15, %v1080_v2  ;;  %v1519_v7 = vmax.f32 %v1089_v63, 0.0  ;;  %v4520_v5 = vpop.f32.mrf.mxu1  ;;  %3954 = vmatpush3.bf16.msra.mxu0 %v4176_v57 }
 0x10c   : > { %v3697_v8 = vpop.f32.mrf.mxu0 }
 0x10d   : > { %v1517_v12 = vmax.f32 %v1081_v4, 0.0  ;;  %v1633_v19 = vpack.c.bf16 %v1519_v7, %v1518_v13  ;;  %v1102_v26 = vadd.f32 %v3697_v8, %v4413_v15 }
 0x10e   : > { %v1093_v14 = vpop.f32.mrf.mxu0 }
 0x10f   : > { %v1632_v18 = vpack.c.bf16 %v1517_v12, %v1516_v11  ;;  %v1094_v23 = vadd.f32 %v4413_v15, %v1093_v14  ;;  %v1522_v37 = vmax.f32 %v1102_v26, 0.0  ;;  %v4522_v12 = vpop.f32.mrf.mxu1 }
 0x110   : > { %v3698_v21 = vpop.f32.mrf.mxu0 }
 0x111   : > { %v1105_v24 = vadd.f32 %v3698_v21, %v4413_v15  ;;  %3835 = vmatprep.mubr.bf16.mxu1 %v1632_v18  ;;  %v1520_v34 = vmax.f32 %v1094_v23, 0.0  ;;  %v4527_v21 = vpop.f32.mrf.mxu1 }
 0x112   : > { %v1096_v27 = vpop.f32.mrf.mxu0  ;;  %3836 = vmatmul.mubr.bf16.gmra.mxu1 %v1633_v19 }
 0x113   : > { %v1097_v29 = vadd.f32 %v4413_v15, %v1096_v27  ;;  %v1523_v31 = vmax.f32 %v1105_v24, 0.0  ;;  %v4530_v27 = vpop.f32.mrf.mxu1 }
 0x114   : > { %v3701_v32 = vpop.f32.mrf.mxu0 }
 0x115   : > { %v1521_v36 = vmax.f32 %v1097_v29, 0.0  ;;  %v1635_v42 = vpack.c.bf16 %v1523_v31, %v1522_v37  ;;  %v1118_v50 = vadd.f32 %v3701_v32, %v4413_v15 }
 0x116   : > { %v1109_v38 = vpop.f32.mrf.mxu0 }
 0x117   : > { %v1634_v41 = vpack.c.bf16 %v1521_v36, %v1520_v34  ;;  %v1110_v47 = vadd.f32 %v4413_v15, %v1109_v38  ;;  %v1526_v2 = vmax.f32 %v1118_v50, 0.0  ;;  %v4532_v36 = vpop.f32.mrf.mxu1 }
 0x118   : > { %v3702_v43 = vpop.f32.mrf.mxu0 }
 0x119   : > { %v1121_v48 = vadd.f32 %v3702_v43, %v4413_v15  ;;  %3839 = vmatprep.mubr.bf16.mxu1 %v1634_v41  ;;  %v1524_v63 = vmax.f32 %v1110_v47, 0.0 }
 0x11a   : > { %v1112_v52 = vpop.f32.mrf.mxu0  ;;  %3840 = vmatmul.mubr.bf16.gmra.mxu1 %v1635_v42  ;;  %v4534_v42 = vpop.f32.mrf.mxu1 }
 0x11b   : > { %v1113_v54 = vadd.f32 %v4413_v15, %v1112_v52  ;;  %v1527_v58 = vmax.f32 %v1121_v48, 0.0 }
 0x11c   : > { %v3705_v59 = vpop.f32.mrf.mxu0  ;;  %v4539_v52 = vpop.f32.mrf.mxu1 }
 0x11d   : > { %v1525_v0 = vmax.f32 %v1113_v54, 0.0  ;;  %v1637_v8 = vpack.c.bf16 %v1527_v58, %v1526_v2  ;;  %v1134_v18 = vadd.f32 %v3705_v59, %v4413_v15 }
 0x11e   : > { %v1125_v4 = vpop.f32.mrf.mxu0  ;;  %v4542_v59 = vpop.f32.mrf.mxu1 }
 0x11f   : > { %v1636_v7 = vpack.c.bf16 %v1525_v0, %v1524_v63  ;;  %v1126_v13 = vadd.f32 %v4413_v15, %v1125_v4  ;;  %v1530_v32 = vmax.f32 %v1134_v18, 0.0 }
 0x120   : > { %v3706_v11 = vpop.f32.mrf.mxu0 }
 0x121   : > { %v1137_v14 = vadd.f32 %v3706_v11, %v4413_v15  ;;  %3843 = vmatprep.mubr.bf16.mxu1 %v1636_v7  ;;  %v1528_v29 = vmax.f32 %v1126_v13, 0.0  ;;  %v4544_v13 = vpop.f32.mrf.mxu1 }
 0x122   : > { %v1128_v19 = vpop.f32.mrf.mxu0  ;;  %3844 = vmatmul.mubr.bf16.gmra.mxu1 %v1637_v8 }
 0x123   : > { %v1129_v23 = vadd.f32 %v4413_v15, %v1128_v19  ;;  %v1531_v24 = vmax.f32 %v1137_v14, 0.0 }
 0x124   : > { %v3709_v26 = vpop.f32.mrf.mxu0 }
 0x125   : > { %v1529_v31 = vmax.f32 %v1129_v23, 0.0  ;;  %v1639_v38 = vpack.c.bf16 %v1531_v24, %v1530_v32  ;;  %v1150_v48 = vadd.f32 %v3709_v26, %v4413_v15 }
 0x126   : > { %v1141_v34 = vpop.f32.mrf.mxu0 }
 0x127   : > { %v1638_v37 = vpack.c.bf16 %v1529_v31, %v1528_v29  ;;  %v1142_v43 = vadd.f32 %v4413_v15, %v1141_v34  ;;  %v1534_v2 = vmax.f32 %v1150_v48, 0.0  ;;  %v4550_v31 = vpop.f32.mrf.mxu1 }
 0x128   : > { %v3710_v41 = vpop.f32.mrf.mxu0 }
 0x129   : > { %v1153_v47 = vadd.f32 %v3710_v41, %v4413_v15  ;;  %3847 = vmatprep.mubr.bf16.mxu1 %v1638_v37  ;;  %v1532_v63 = vmax.f32 %v1142_v43, 0.0  ;;  %v4552_v48 = vpop.f32.mrf.mxu1 }
 0x12a   : > { %v1144_v50 = vpop.f32.mrf.mxu0  ;;  %3848 = vmatmul.mubr.bf16.gmra.mxu1 %v1639_v38 }
 0x12b   : > { %v1145_v54 = vadd.f32 %v4413_v15, %v1144_v50  ;;  %v1535_v57 = vmax.f32 %v1153_v47, 0.0 }
 0x12c   : > { %v3713_v58 = vpop.f32.mrf.mxu0 }
 0x12d   : > { %v1533_v0 = vmax.f32 %v1145_v54, 0.0  ;;  %v1641_v8 = vpack.c.bf16 %v1535_v57, %v1534_v2  ;;  %v1166_v19 = vadd.f32 %v3713_v58, %v4413_v15 }
 0x12e   : > { %v1157_v4 = vpop.f32.mrf.mxu0 }
 0x12f   : > { %v1640_v7 = vpack.c.bf16 %v1533_v0, %v1532_v63  ;;  %v1158_v14 = vadd.f32 %v4413_v15, %v1157_v4  ;;  %v1538_v37 = vmax.f32 %v1166_v19, 0.0  ;;  %v4558_v4 = vpop.f32.mrf.mxu1 }
 0x130   : > { %v3714_v11 = vpop.f32.mrf.mxu0 }
 0x131   : > { %v1169_v18 = vadd.f32 %v3714_v11, %v4413_v15  ;;  %3851 = vmatprep.mubr.bf16.mxu1 %v1640_v7  ;;  %v1536_v32 = vmax.f32 %v1158_v14, 0.0 }
 0x132   : > { %v1160_v23 = vpop.f32.mrf.mxu0  ;;  %3852 = vmatmul.mubr.bf16.gmra.mxu1 %v1641_v8 }
 0x133   : > { %v1161_v24 = vadd.f32 %v4413_v15, %v1160_v23  ;;  %v1539_v26 = vmax.f32 %v1169_v18, 0.0 }
 0x134   : > { %v3717_v29 = vpop.f32.mrf.mxu0 }
 0x135   : > { %v1537_v34 = vmax.f32 %v1161_v24, 0.0  ;;  %v1643_v43 = vpack.c.bf16 %v1539_v26, %v1538_v37  ;;  %v1182_v57 = vadd.f32 %v3717_v29, %v4413_v15  ;;  %v4560_v24 = vpop.f32.mrf.mxu1 }
 0x136   : > { %v1173_v38 = vpop.f32.mrf.mxu0 }
 0x137   : > { %v1642_v41 = vpack.c.bf16 %v1537_v34, %v1536_v32  ;;  %v1174_v50 = vadd.f32 %v4413_v15, %v1173_v38  ;;  %v1542_v11 = vmax.f32 %v1182_v57, 0.0 }
 0x138   : > { %v3718_v47 = vpop.f32.mrf.mxu0 }
 0x139   : > { %v1185_v54 = vadd.f32 %v3718_v47, %v4413_v15  ;;  %3855 = vmatprep.mubr.bf16.mxu1 %v1642_v41  ;;  %v1540_v7 = vmax.f32 %v1174_v50, 0.0 }
 0x13a   : > { %v1176_v58 = vpop.f32.mrf.mxu0  ;;  %3856 = vmatmul.mubr.bf16.gmra.mxu1 %v1643_v43  ;;  %v4566_v43 = vpop.f32.mrf.mxu1 }
 0x13b   : > { %v1177_v63 = vadd.f32 %v4413_v15, %v1176_v58  ;;  %v1543_v0 = vmax.f32 %v1185_v54, 0.0 }
 0x13c   : > { %v3721_v2 = vpop.f32.mrf.mxu0 }
 0x13d   : > { %v1541_v8 = vmax.f32 %v1177_v63, 0.0  ;;  %v1645_v19 = vpack.c.bf16 %v1543_v0, %v1542_v11  ;;  %v1198_v32 = vadd.f32 %v3721_v2, %v4413_v15 }
 0x13e   : > { %v1189_v14 = vpop.f32.mrf.mxu0 }
 0x13f   : > { %v1644_v18 = vpack.c.bf16 %v1541_v8, %v1540_v7  ;;  %v1190_v26 = vadd.f32 %v4413_v15, %v1189_v14  ;;  %v1546_v54 = vmax.f32 %v1198_v32, 0.0  ;;  %v4568_v7 = vpop.f32.mrf.mxu1 }
 0x140   : > { %v3722_v23 = vpop.f32.mrf.mxu0 }
 0x141   : > { %v1201_v29 = vadd.f32 %v3722_v23, %v4413_v15  ;;  %3859 = vmatprep.mubr.bf16.mxu1 %v1644_v18  ;;  %v1544_v47 = vmax.f32 %v1190_v26, 0.0  ;;  %v4574_v26 = vpop.f32.mrf.mxu1 }
 0x142   : > { %v1192_v34 = vpop.f32.mrf.mxu0  ;;  %3860 = vmatmul.mubr.bf16.gmra.mxu1 %v1645_v19 }
 0x143   : > { %v1193_v37 = vadd.f32 %v4413_v15, %v1192_v34  ;;  %v1547_v38 = vmax.f32 %v1201_v29, 0.0 }
 0x144   : > { %v3725_v41 = vpop.f32.mrf.mxu0 }
 0x145   : > { %v1545_v50 = vmax.f32 %v1193_v37, 0.0  ;;  %v1647_v63 = vpack.c.bf16 %v1547_v38, %v1546_v54  ;;  %v1214_v11 = vadd.f32 %v3725_v41, %v4413_v15  ;;  %v4576_v54 = vpop.f32.mrf.mxu1  ;;  %v1238_v41 = vadd.f32 %v4413_v15, %v4431_v51 }
 0x146   : > { %v1205_v57 = vpop.f32.mrf.mxu0 }
 0x147   : > { %v1646_v58 = vpack.c.bf16 %v1545_v50, %v1544_v47  ;;  %v1206_v8 = vadd.f32 %v4413_v15, %v1205_v57  ;;  %v1550_v34 = vmax.f32 %v1214_v11, 0.0  ;;  %v1241_v57 = vadd.f32 %v4413_v15, %v4439_v61 }
 0x148   : > { %v3726_v0 = vpop.f32.mrf.mxu0 }
 0x149   : > { %v1217_v2 = vadd.f32 %v3726_v0, %v4413_v15  ;;  %3863 = vmatprep.mubr.bf16.mxu1 %v1646_v58  ;;  %v1548_v29 = vmax.f32 %v1206_v8, 0.0 }
 0x14a   : > { %v1208_v14 = vpop.f32.mrf.mxu0  ;;  %3864 = vmatmul.mubr.bf16.gmra.mxu1 %v1647_v63 }
 0x14b   : > { %v1209_v18 = vadd.f32 %v4413_v15, %v1208_v14  ;;  %v1551_v19 = vmax.f32 %v1217_v2, 0.0  ;;  %v4586_v14 = vpop.f32.mrf.mxu1 }
 0x14c   : > { %v3729_v23 = vpop.f32.mrf.mxu0 }
 0x14d   : > { %v1549_v32 = vmax.f32 %v1209_v18, 0.0  ;;  %v1649_v47 = vpack.c.bf16 %v1551_v19, %v1550_v34  ;;  %v1230_v0 = vadd.f32 %v3729_v23, %v4413_v15  ;;  %v1556_v18 = vmax.f32 %v1238_v41, 0.0 }
 0x14e   : > { %v1221_v37 = vpop.f32.mrf.mxu0  ;;  %v1557_v19 = vmax.f32 %v1241_v57, 0.0  ;;  %v1246_v34 = vadd.f32 %v4426_v46, %v4413_v15 }
 0x14f   : > { %v1648_v38 = vpack.c.bf16 %v1549_v32, %v1548_v29  ;;  %v1222_v58 = vadd.f32 %v4413_v15, %v1221_v37  ;;  %v1554_v32 = vmax.f32 %v1230_v0, 0.0  ;;  %v1249_v37 = vadd.f32 %v4437_v56, %v4413_v15 }
 0x150   : > { %v3730_v50 = vpop.f32.mrf.mxu0  ;;  %v1652_v41 = vpack.c.bf16 %v1557_v19, %v1556_v18  ;;  %v1558_v57 = vmax.f32 %v1246_v34, 0.0  ;;  %v1281_v34 = vadd.f32 %v4464_v30, %v4413_v15  ;;  %v1294_v30 = vadd.f32 %v4468_v39, %v4413_v15 }
 0x151   : > { %v1233_v63 = vadd.f32 %v3730_v50, %v4413_v15  ;;  %3867 = vmatprep.mubr.bf16.mxu1 %v1648_v38  ;;  %v1552_v51 = vmax.f32 %v1222_v58, 0.0  ;;  %v4592_v38 = vpop.f32.mrf.mxu1  ;;  %v1257_v50 = vadd.f32 %v4413_v15, %v4451_v16  ;;  %v1559_v58 = vmax.f32 %v1249_v37, 0.0 }
 0x152   : > { %v1224_v8 = vpop.f32.mrf.mxu0  ;;  %3868 = vmatmul.mubr.bf16.gmra.mxu1 %v1649_v47  ;;  %v1254_v47 = vadd.f32 %v4413_v15, %v4446_v6  ;;  %v1265_v6 = vadd.f32 %v4449_v10, %v4413_v15  ;;  %v1270_v16 = vadd.f32 %v4413_v15, %v4458_v25  ;;  %v1278_v10 = vadd.f32 %v4453_v20, %v4413_v15 }
 0x153   : > { %v1225_v2 = vadd.f32 %v4413_v15, %v1224_v8  ;;  %v1555_v11 = vmax.f32 %v1233_v63, 0.0  ;;  %v4598_v63 = vpop.f32.mrf.mxu1  ;;  %v1561_v0 = vmax.f32 %v1257_v50, 0.0  ;;  %v1653_v56 = vpack.c.bf16 %v1559_v58, %v1558_v57 }
 0x154   : > { %v1560_v46 = vmax.f32 %v1254_v47, 0.0  ;;  %v1262_v8 = vadd.f32 %v4441_v1, %v4413_v15  ;;  %v1289_v37 = vadd.f32 %v4413_v15, %v4478_v55  ;;  %v1566_v47 = vmax.f32 %v1278_v10, 0.0 }
 0x155   : > { %v1553_v29 = vmax.f32 %v1225_v2, 0.0  ;;  %v1651_v23 = vpack.c.bf16 %v1555_v11, %v1554_v32  ;;  %v4604_v2 = vpop.f32.mrf.mxu1  ;;  %v1273_v11 = vadd.f32 %v4413_v15, %v4466_v35  ;;  %v1564_v32 = vmax.f32 %v1270_v16, 0.0 }
 0x156   : > { %v1654_v18 = vpack.c.bf16 %v1561_v0, %v1560_v46  ;;  %v1562_v19 = vmax.f32 %v1262_v8, 0.0  ;;  %v1286_v35 = vadd.f32 %v4413_v15, %v4473_v44  ;;  %v1567_v50 = vmax.f32 %v1281_v34, 0.0 }
 0x157   : > { %v1650_v61 = vpack.c.bf16 %v1553_v29, %v1552_v51  ;;  %v1563_v51 = vmax.f32 %v1265_v6, 0.0  ;;  %v4610_v29 = vpop.f32.mrf.mxu1  ;;  %v1565_v1 = vmax.f32 %v1273_v11, 0.0  ;;  %v1569_v20 = vmax.f32 %v1289_v37, 0.0 }
 0x158   : > { %v1568_v57 = vmax.f32 %v1286_v35, 0.0  ;;  %v1657_v58 = vpack.c.bf16 %v1567_v50, %v1566_v47  ;;  %v1297_v46 = vadd.f32 %v4476_v49, %v4413_v15  ;;  %v1302_v55 = vadd.f32 %v4413_v15, %v4485_v3 }
 0x159   : > { %3871 = vmatprep.mubr.bf16.mxu1 %v1650_v61  ;;  %v1655_v61 = vpack.c.bf16 %v1563_v51, %v1562_v19  ;;  %v4616_v25 = vpop.f32.mrf.mxu1  ;;  %v1305_v0 = vadd.f32 %v4413_v15, %v4493_v17  ;;  %v1570_v8 = vmax.f32 %v1294_v30, 0.0  ;;  %v1310_v49 = vadd.f32 %v4480_v60, %v4413_v15 }
 0x15a   : > { %3872 = vmatmul.mubr.bf16.gmra.mxu1 %v1651_v23  ;;  %v1656_v23 = vpack.c.bf16 %v1565_v1, %v1564_v32  ;;  %v1571_v6 = vmax.f32 %v1297_v46, 0.0  ;;  %v1572_v11 = vmax.f32 %v1302_v55, 0.0  ;;  %v1313_v19 = vadd.f32 %v4491_v9, %v4413_v15 }
 0x15b   : > { %3875 = vmatprep.mubr.bf16.mxu1 %v1652_v41  ;;  %v4622_v41 = vpop.f32.mrf.mxu1  ;;  %v1573_v39 = vmax.f32 %v1305_v0, 0.0  ;;  %v1318_v17 = vadd.f32 %v4413_v15, %v4500_v28  ;;  %v1321_v51 = vadd.f32 %v4413_v15, %v4505_v40  ;;  %v1574_v1 = vmax.f32 %v1310_v49, 0.0 }
 0x15c   : > { %v1326_v9 = vadd.f32 %v4495_v22, %v4413_v15  ;;  %v1329_v37 = vadd.f32 %v4503_v33, %v4413_v15  ;;  %v1334_v40 = vadd.f32 %v4413_v15, %v4512_v53  ;;  %v1342_v33 = vadd.f32 %v4507_v45, %v4413_v15 }
 0x15d   : > { %v4628_v44 = vpop.f32.mrf.mxu1  ;;  %v1660_v32 = vpack.c.bf16 %v1573_v39, %v1572_v11  ;;  %v1576_v34 = vmax.f32 %v1318_v17, 0.0  ;;  %v1577_v60 = vmax.f32 %v1321_v51, 0.0  ;;  %v1345_v46 = vadd.f32 %v4518_v62, %v4413_v15 }
 0x15e   : > { %v1578_v50 = vmax.f32 %v1326_v9, 0.0  ;;  %v1353_v55 = vadd.f32 %v4413_v15, %v4532_v36  ;;  %v1358_v62 = vadd.f32 %v4522_v12, %v4413_v15  ;;  %v1366_v36 = vadd.f32 %v4413_v15, %v4539_v52 }
 0x15f   : > { %v4634_v16 = vpop.f32.mrf.mxu1  ;;  %v1662_v47 = vpack.c.bf16 %v1577_v60, %v1576_v34  ;;  %v1369_v49 = vadd.f32 %v4413_v15, %v4544_v13  ;;  %v1377_v34 = vadd.f32 %v4542_v59, %v4413_v15  ;;  %v1382_v13 = vadd.f32 %v4413_v15, %v4552_v48 }
 0x160   : > { %v1585_v45 = vmax.f32 %v1353_v55, 0.0  ;;  %v1586_v17 = vmax.f32 %v1358_v62, 0.0  ;;  %v1385_v60 = vadd.f32 %v4413_v15, %v4560_v24  ;;  %v1390_v59 = vadd.f32 %v4550_v31, %v4413_v15 }
 0x161   : > { %v4640_v3 = vpop.f32.mrf.mxu1  ;;  %v1589_v12 = vmax.f32 %v1369_v49, 0.0  ;;  %v1398_v24 = vadd.f32 %v4413_v15, %v4568_v7  ;;  %v1417_v62 = vadd.f32 %v4413_v15, %v4604_v2 }
 0x162   : > { %3876 = vmatmul.mubr.bf16.gmra.mxu1 %v1653_v56  ;;  %v1658_v56 = vpack.c.bf16 %v1569_v20, %v1568_v57  ;;  %v1579_v57 = vmax.f32 %v1329_v37, 0.0  ;;  %v1591_v37 = vmax.f32 %v1377_v34, 0.0 }
 0x163   : > { %3879 = vmatprep.mubr.bf16.mxu1 %v1654_v18  ;;  %v1659_v18 = vpack.c.bf16 %v1571_v6, %v1570_v8  ;;  %v4646_v10 = vpop.f32.mrf.mxu1  ;;  %v1583_v8 = vmax.f32 %v1345_v46, 0.0 }
 0x164   : > { %v1663_v30 = vpack.c.bf16 %v1579_v57, %v1578_v50  ;;  %v1393_v50 = vadd.f32 %v4558_v4, %v4413_v15  ;;  %v1401_v57 = vadd.f32 %v4413_v15, %v4576_v54  ;;  %v4709_v4 = vld [vmem:[%s5295_s4] ss:$0 sm:$0xff] }
 0x165   : > { %v4652_v28 = vpop.f32.mrf.mxu1 }
 0x166   : > { %v1597_v31 = vmax.f32 %v1401_v57, 0.0 }
 0x167   : > { %v4658_v20 = vpop.f32.mrf.mxu1 }
 0x169   : > { %v4664_v53 = vpop.f32.mrf.mxu1 }
 0x16a   : > { %3880 = vmatmul.mubr.bf16.gmra.mxu1 %v1655_v61  ;;  %v1575_v61 = vmax.f32 %v1313_v19, 0.0 }
 0x16b   : > { %3883 = vmatprep.mubr.bf16.mxu1 %v1656_v23  ;;  %v1337_v23 = vadd.f32 %v4413_v15, %v4520_v5  ;;  %v1350_v5 = vadd.f32 %v4413_v15, %v4527_v21  ;;  %v4670_v6 = vpop.f32.mrf.mxu1 }
 0x16c   : > { %v1661_v35 = vpack.c.bf16 %v1575_v61, %v1574_v1  ;;  %v1588_v1 = vmax.f32 %v1366_v36, 0.0 }
 0x16d   : > { %v1581_v22 = vmax.f32 %v1337_v23, 0.0  ;;  %v1584_v11 = vmax.f32 %v1350_v5, 0.0  ;;  %v4676_v21 = vpop.f32.mrf.mxu1  ;;  %v1592_v23 = vmax.f32 %v1382_v13, 0.0  ;;  %v1596_v5 = vmax.f32 %v1398_v24, 0.0 }
 0x16f   : > { %v1666_v19 = vpack.c.bf16 %v1585_v45, %v1584_v11  ;;  %v1672_v36 = vpack.c.bf16 %v1597_v31, %v1596_v5 }
 0x172   : > { %3884 = vmatmul.mubr.bf16.gmra.mxu1 %v1657_v58  ;;  %v1580_v58 = vmax.f32 %v1334_v40, 0.0 }
 0x173   : > { %3887 = vmatprep.mubr.bf16.mxu1 %v1658_v56  ;;  %v1582_v56 = vmax.f32 %v1342_v33, 0.0  ;;  %v1595_v33 = vmax.f32 %v1393_v50, 0.0 }
 0x174   : > { %v1664_v0 = vpack.c.bf16 %v1581_v22, %v1580_v58 }
 0x175   : > { %v1665_v39 = vpack.c.bf16 %v1583_v8, %v1582_v56  ;;  %v1406_v56 = vadd.f32 %v4566_v43, %v4413_v15  ;;  %v1409_v8 = vadd.f32 %v4574_v26, %v4413_v15 }
 0x177   : > { %v1599_v26 = vmax.f32 %v1409_v8, 0.0 }
 0x17a   : > { %3888 = vmatmul.mubr.bf16.gmra.mxu1 %v1659_v18  ;;  %v1361_v18 = vadd.f32 %v4530_v27, %v4413_v15  ;;  %v1374_v27 = vadd.f32 %v4534_v42, %v4413_v15  ;;  %v1593_v42 = vmax.f32 %v1385_v60, 0.0 }
 0x17b   : > { %3891 = vmatprep.mubr.bf16.mxu1 %v1660_v32  ;;  %v4682_v32 = vpop.f32.mrf.mxu1 }
 0x17c   : > { %v1587_v51 = vmax.f32 %v1361_v18, 0.0  ;;  %v1590_v9 = vmax.f32 %v1374_v27, 0.0  ;;  %v1670_v58 = vpack.c.bf16 %v1593_v42, %v1592_v23  ;;  %v1601_v27 = vmax.f32 %v1417_v62, 0.0 }
 0x17d   : > { %v4688_v52 = vpop.f32.mrf.mxu1 }
 0x17e   : > { %v1667_v61 = vpack.c.bf16 %v1587_v51, %v1586_v17  ;;  %v1598_v51 = vmax.f32 %v1406_v56, 0.0 }
 0x17f   : > { %v4694_v40 = vpop.f32.mrf.mxu1 }
 0x181   : > { %v4700_v48 = vpop.f32.mrf.mxu1 }
 0x182   : > { %3892 = vmatmul.mubr.bf16.gmra.mxu1 %v1661_v35  ;;  %v1668_v35 = vpack.c.bf16 %v1589_v12, %v1588_v1 }
 0x183   : > { %3895 = vmatprep.mubr.bf16.mxu1 %v1662_v47  ;;  %v1669_v47 = vpack.c.bf16 %v1591_v37, %v1590_v9  ;;  %v1422_v9 = vadd.f32 %v4586_v14, %v4413_v15  ;;  %v1425_v37 = vadd.f32 %v4598_v63, %v4413_v15 }
 0x185   : > { %v1602_v63 = vmax.f32 %v1422_v9, 0.0 }
 0x18a   : > { %3896 = vmatmul.mubr.bf16.gmra.mxu1 %v1663_v30  ;;  %v1594_v30 = vmax.f32 %v1390_v59, 0.0  ;;  %v1433_v59 = vadd.f32 %v4413_v15, %v4628_v44 }
 0x18b   : > { %3899 = vmatprep.mubr.bf16.mxu1 %v1664_v0 }
 0x18c   : > { %v1671_v54 = vpack.c.bf16 %v1595_v33, %v1594_v30  ;;  %v1603_v30 = vmax.f32 %v1425_v37, 0.0  ;;  %v1605_v31 = vmax.f32 %v1433_v59, 0.0 }
 0x192   : > { %3900 = vmatmul.mubr.bf16.gmra.mxu1 %v1665_v39  ;;  %v1414_v39 = vadd.f32 %v4413_v15, %v4592_v38 }
 0x193   : > { %3903 = vmatprep.mubr.bf16.mxu1 %v1666_v19 }
 0x19a   : > { %3904 = vmatmul.mubr.bf16.gmra.mxu1 %v1667_v61  ;;  %v1600_v61 = vmax.f32 %v1414_v39, 0.0 }
 0x19b   : > { %3907 = vmatprep.mubr.bf16.mxu1 %v1668_v35  ;;  %v1673_v35 = vpack.c.bf16 %v1599_v26, %v1598_v51 }
 0x19c   : > { %v1674_v24 = vpack.c.bf16 %v1601_v27, %v1600_v61 }
 0x1a2   : > { %v3813_v22 = vpop.f32.mrf.mxu1  ;;  %3908 = vmatmul.mubr.bf16.gmra.mxu1 %v1669_v47  ;;  %v1430_v47 = vadd.f32 %v4413_v15, %v4616_v25 }
 0x1a3   : > { %3911 = vmatprep.mubr.bf16.mxu1 %v1670_v58  ;;  %v1798_v11 = vadd.f32 %v3813_v22, %v4709_v4 }
 0x1a4   : > { %v1789_v46 = vpop.f32.mrf.mxu1  ;;  %v1604_v5 = vmax.f32 %v1430_v47, 0.0 }
 0x1a5   : > { %v1790_v7 = vadd.f32 %v4709_v4, %v1789_v46  ;;  %v2302_v1 = vmax.f32 %v1798_v11, 0.0 }
 0x1a6   : > { %v3814_v55 = vpop.f32.mrf.mxu1 }
 0x1a7   : > { %v1801_v0 = vadd.f32 %v3814_v55, %v4709_v4  ;;  %v2300_v17 = vmax.f32 %v1790_v7, 0.0 }
 0x1a8   : > { %v1792_v45 = vpop.f32.mrf.mxu1 }
 0x1a9   : > { %v1793_v18 = vadd.f32 %v4709_v4, %v1792_v45  ;;  %v2303_v49 = vmax.f32 %v1801_v0, 0.0  ;;  %v1675_v0 = vpack.c.bf16 %v1603_v30, %v1602_v63 }
 0x1aa   : > { %v3817_v19 = vpop.f32.mrf.mxu1  ;;  %3912 = vmatmul.mubr.bf16.gmra.mxu1 %v1671_v54  ;;  %v4740_v54 = vld [vmem:[%s5293_s2] ss:$0 sm:$0xff] }
 0x1ab   : > { %v2301_v43 = vmax.f32 %v1793_v18, 0.0  ;;  %3915 = vmatprep.mubr.bf16.mxu1 %v1672_v36  ;;  %v2429_v38 = vpack.c.bf16 %v2303_v49, %v2302_v1  ;;  %v1814_v23 = vadd.f32 %v3817_v19, %v4709_v4  ;;  %v1438_v56 = vadd.f32 %v4740_v54, %v4610_v29 }
 0x1ac   : > { %v1805_v12 = vpop.f32.mrf.mxu1  ;;  %v1441_v8 = vadd.f32 %v4740_v54, %v4622_v41  ;;  %v1446_v39 = vadd.f32 %v4740_v54, %v4640_v3  ;;  %v1449_v62 = vadd.f32 %v4740_v54, %v4652_v28  ;;  %v1676_v36 = vpack.c.bf16 %v1605_v31, %v1604_v5 }
 0x1ad   : > { %v2428_v34 = vpack.c.bf16 %v2301_v43, %v2300_v17  ;;  %v1806_v2 = vadd.f32 %v4709_v4, %v1805_v12  ;;  %v2306_v33 = vmax.f32 %v1814_v23, 0.0  ;;  %v1606_v41 = vmax.f32 %v1438_v56, 0.0 }
 0x1ae   : > { %v3818_v13 = vpop.f32.mrf.mxu1  ;;  %v1607_v43 = vmax.f32 %v1441_v8, 0.0  ;;  %v1608_v1 = vmax.f32 %v1446_v39, 0.0  ;;  %v1609_v12 = vmax.f32 %v1449_v62, 0.0  ;;  %v1462_v9 = vadd.f32 %v4740_v54, %v4664_v53 }
 0x1af   : > { %v1817_v60 = vadd.f32 %v3818_v13, %v4709_v4  ;;  %3955 = vmatprep.mubr.bf16.mxu0 %v2428_v34  ;;  %v2304_v14 = vmax.f32 %v1806_v2, 0.0  ;;  %v1454_v13 = vadd.f32 %v4740_v54, %v4634_v16  ;;  %v1457_v2 = vadd.f32 %v4740_v54, %v4646_v10 }
 0x1b0   : > { %v1808_v42 = vpop.f32.mrf.mxu1  ;;  %3956 = vmatmul.mubr.bf16.vlgmr.msra.gmra.mxu0 %v2429_v38  ;;  %v1677_v38 = vpack.c.bf16 %v1607_v43, %v1606_v41  ;;  %v1465_v37 = vadd.f32 %v4740_v54, %v4676_v21  ;;  %v1470_v5 = vadd.f32 %v4740_v54, %v4658_v20  ;;  %v1473_v31 = vadd.f32 %v4740_v54, %v4670_v6 }
 0x1b1   : > { %v1809_v50 = vadd.f32 %v4709_v4, %v1808_v42  ;;  %v2307_v57 = vmax.f32 %v1817_v60, 0.0  ;;  %v1678_v42 = vpack.c.bf16 %v1609_v12, %v1608_v1  ;;  %v1610_v10 = vmax.f32 %v1454_v13, 0.0 }
 0x1b2   : > { %v3821_v58 = vpop.f32.mrf.mxu1  ;;  %3916 = vmatmul.mubr.bf16.gmra.mxu1 %v1673_v35  ;;  %v1614_v6 = vmax.f32 %v1470_v5, 0.0  ;;  %v1486_v41 = vadd.f32 %v4740_v54, %v4682_v32  ;;  %v1489_v43 = vadd.f32 %v4740_v54, %v4694_v40 }
 0x1b3   : > { %v2305_v22 = vmax.f32 %v1809_v50, 0.0  ;;  %3919 = vmatprep.mubr.bf16.mxu1 %v1674_v24  ;;  %v2431_v25 = vpack.c.bf16 %v2307_v57, %v2306_v33  ;;  %v1830_v11 = vadd.f32 %v3821_v58, %v4709_v4  ;;  %v1611_v24 = vmax.f32 %v1457_v2, 0.0 }
 0x1b4   : > { %v1821_v46 = vpop.f32.mrf.mxu1 }
 0x1b5   : > { %v2430_v55 = vpack.c.bf16 %v2305_v22, %v2304_v14  ;;  %v1822_v15 = vadd.f32 %v4709_v4, %v1821_v46  ;;  %v2310_v51 = vmax.f32 %v1830_v11, 0.0  ;;  %v1612_v14 = vmax.f32 %v1462_v9, 0.0 }
 0x1b6   : > { %v3822_v7 = vpop.f32.mrf.mxu1  ;;  %v1613_v22 = vmax.f32 %v1465_v37, 0.0  ;;  %v1679_v46 = vpack.c.bf16 %v1611_v24, %v1610_v10 }
 0x1b7   : > { %v1833_v44 = vadd.f32 %v3822_v7, %v4709_v4  ;;  %3959 = vmatprep.mubr.bf16.mxu0 %v2430_v55  ;;  %v2308_v29 = vmax.f32 %v1822_v15, 0.0  ;;  %v1478_v7 = vadd.f32 %v4740_v54, %v4688_v52  ;;  %v1481_v15 = vadd.f32 %v4740_v54, %v4700_v48 }
 0x1b8   : > { %v1824_v45 = vpop.f32.mrf.mxu1  ;;  %3960 = vmatmul.mubr.bf16.gmra.mxu0 %v2431_v25 }
 0x1b9   : > { %v1825_v18 = vadd.f32 %v4709_v4, %v1824_v45  ;;  %v2311_v49 = vmax.f32 %v1833_v44, 0.0  ;;  %v1615_v45 = vmax.f32 %v1473_v31, 0.0 }
 0x1ba   : > { %v3825_v19 = vpop.f32.mrf.mxu1  ;;  %3920 = vmatmul.mubr.bf16.gmra.mxu1 %v1675_v0  ;;  %v1680_v0 = vpack.c.bf16 %v1613_v22, %v1612_v14 }
 0x1bb   : > { %v2309_v17 = vmax.f32 %v1825_v18, 0.0  ;;  %3923 = vmatprep.mubr.bf16.mxu1 %v1676_v36  ;;  %v2433_v3 = vpack.c.bf16 %v2311_v49, %v2310_v51  ;;  %v1846_v60 = vadd.f32 %v3825_v19, %v4709_v4  ;;  %v1616_v18 = vmax.f32 %v1478_v7, 0.0 }
 0x1bc   : > { %v1837_v26 = vpop.f32.mrf.mxu1  ;;  %v1617_v36 = vmax.f32 %v1481_v15, 0.0 }
 0x1bd   : > { %v2432_v61 = vpack.c.bf16 %v2309_v17, %v2308_v29  ;;  %v1838_v28 = vadd.f32 %v4709_v4, %v1837_v26  ;;  %v2314_v57 = vmax.f32 %v1846_v60, 0.0  ;;  %v1681_v17 = vpack.c.bf16 %v1615_v45, %v1614_v6 }
 0x1be   : > { %v3826_v27 = vpop.f32.mrf.mxu1  ;;  %v1682_v12 = vpack.c.bf16 %v1617_v36, %v1616_v18 }
 0x1bf   : > { %v1849_v34 = vadd.f32 %v3826_v27, %v4709_v4  ;;  %3963 = vmatprep.mubr.bf16.mxu0 %v2432_v61  ;;  %v2312_v16 = vmax.f32 %v1838_v28, 0.0 }
 0x1c0   : > { %v1840_v35 = vpop.f32.mrf.mxu1  ;;  %3964 = vmatmul.mubr.bf16.gmra.mxu0 %v2433_v3 }
 0x1c1   : > { %v1841_v23 = vadd.f32 %v4709_v4, %v1840_v35  ;;  %v2315_v47 = vmax.f32 %v1849_v34, 0.0  ;;  %v1618_v34 = vmax.f32 %v1486_v41, 0.0 }
 0x1c2   : > { %v3829_v59 = vpop.f32.mrf.mxu1  ;;  %3924 = vmatmul.mubr.bf16.gmra.mxu1 %v1677_v38  ;;  %v1619_v38 = vmax.f32 %v1489_v43, 0.0 }
 0x1c3   : > { %v2313_v50 = vmax.f32 %v1841_v23, 0.0  ;;  %3927 = vmatprep.mubr.bf16.mxu1 %v1678_v42  ;;  %v2435_v53 = vpack.c.bf16 %v2315_v47, %v2314_v57  ;;  %v1862_v55 = vadd.f32 %v3829_v59, %v4709_v4 }
 0x1c4   : > { %v1853_v58 = vpop.f32.mrf.mxu1  ;;  %v1683_v9 = vpack.c.bf16 %v1619_v38, %v1618_v34 }
 0x1c5   : > { %v2434_v63 = vpack.c.bf16 %v2313_v50, %v2312_v16  ;;  %v1854_v21 = vadd.f32 %v4709_v4, %v1853_v58  ;;  %v2318_v39 = vmax.f32 %v1862_v55, 0.0 }
 0x1c6   : > { %v3830_v30 = vpop.f32.mrf.mxu1 }
 0x1c7   : > { %v1865_v33 = vadd.f32 %v3830_v30, %v4709_v4  ;;  %3967 = vmatprep.mubr.bf16.mxu0 %v2434_v63  ;;  %v2316_v20 = vmax.f32 %v1854_v21, 0.0 }
 0x1c8   : > { %v1856_v25 = vpop.f32.mrf.mxu1  ;;  %3968 = vmatmul.mubr.bf16.gmra.mxu0 %v2435_v53 }
 0x1c9   : > { %v1857_v44 = vadd.f32 %v4709_v4, %v1856_v25  ;;  %v2319_v56 = vmax.f32 %v1865_v33, 0.0 }
 0x1ca   : > { %v3833_v8 = vpop.f32.mrf.mxu1  ;;  %3928 = vmatmul.mubr.bf16.gmra.mxu1 %v1679_v46 }
 0x1cb   : > { %v2317_v11 = vmax.f32 %v1857_v44, 0.0  ;;  %3931 = vmatprep.mubr.bf16.mxu1 %v1680_v0  ;;  %v2437_v52 = vpack.c.bf16 %v2319_v56, %v2318_v39  ;;  %v1878_v51 = vadd.f32 %v3833_v8, %v4709_v4 }
 0x1cc   : > { %v1869_v62 = vpop.f32.mrf.mxu1 }
 0x1cd   : > { %v2436_v49 = vpack.c.bf16 %v2317_v11, %v2316_v20  ;;  %v1870_v48 = vadd.f32 %v4709_v4, %v1869_v62  ;;  %v2322_v13 = vmax.f32 %v1878_v51, 0.0 }
 0x1ce   : > { %v3834_v19 = vpop.f32.mrf.mxu1 }
 0x1cf   : > { %v1881_v29 = vadd.f32 %v3834_v19, %v4709_v4  ;;  %3971 = vmatprep.mubr.bf16.mxu0 %v2436_v49  ;;  %v2320_v27 = vmax.f32 %v1870_v48, 0.0 }
 0x1d0   : > { %v1872_v26 = vpop.f32.mrf.mxu1  ;;  %3972 = vmatmul.mubr.bf16.gmra.mxu0 %v2437_v52 }
 0x1d1   : > { %v1873_v1 = vadd.f32 %v4709_v4, %v1872_v26  ;;  %v2323_v61 = vmax.f32 %v1881_v29, 0.0 }
 0x1d2   : > { %v3837_v3 = vpop.f32.mrf.mxu1  ;;  %3932 = vmatmul.mubr.bf16.gmra.mxu1 %v1681_v17 }
 0x1d3   : > { %v2321_v28 = vmax.f32 %v1873_v1, 0.0  ;;  %3935 = vmatprep.mubr.bf16.mxu1 %v1682_v12  ;;  %v2439_v60 = vpack.c.bf16 %v2323_v61, %v2322_v13  ;;  %v1894_v37 = vadd.f32 %v3837_v3, %v4709_v4 }
 0x1d4   : > { %v1885_v32 = vpop.f32.mrf.mxu1 }
 0x1d5   : > { %v2438_v2 = vpack.c.bf16 %v2321_v28, %v2320_v27  ;;  %v1886_v54 = vadd.f32 %v4709_v4, %v1885_v32  ;;  %v2326_v10 = vmax.f32 %v1894_v37, 0.0 }
 0x1d6   : > { %v3838_v40 = vpop.f32.mrf.mxu1 }
 0x1d7   : > { %v1897_v35 = vadd.f32 %v3838_v40, %v4709_v4  ;;  %3975 = vmatprep.mubr.bf16.mxu0 %v2438_v2  ;;  %v2324_v16 = vmax.f32 %v1886_v54, 0.0 }
 0x1d8   : > { %v1888_v23 = vpop.f32.mrf.mxu1  ;;  %3976 = vmatmul.mubr.bf16.gmra.mxu0 %v2439_v60 }
 0x1d9   : > { %v1889_v42 = vadd.f32 %v4709_v4, %v1888_v23  ;;  %v2327_v47 = vmax.f32 %v1897_v35, 0.0 }
 0x1da   : > { %v3841_v59 = vpop.f32.mrf.mxu1  ;;  %3936 = vmatmul.mubr.bf16.gmra.mxu1 %v1683_v9 }
 0x1db   : > { %v2325_v50 = vmax.f32 %v1889_v42, 0.0  ;;  %v2441_v58 = vpack.c.bf16 %v2327_v47, %v2326_v10  ;;  %v1910_v53 = vadd.f32 %v3841_v59, %v4709_v4 }
 0x1dc   : > { %v1901_v24 = vpop.f32.mrf.mxu1 }
 0x1dd   : > { %v2440_v57 = vpack.c.bf16 %v2325_v50, %v2324_v16  ;;  %v1902_v22 = vadd.f32 %v4709_v4, %v1901_v24  ;;  %v2330_v55 = vmax.f32 %v1910_v53, 0.0 }
 0x1de   : > { %v3842_v14 = vpop.f32.mrf.mxu1 }
 0x1df   : > { %v1913_v63 = vadd.f32 %v3842_v14, %v4709_v4  ;;  %3979 = vmatprep.mubr.bf16.mxu0 %v2440_v57  ;;  %v2328_v5 = vmax.f32 %v1902_v22, 0.0 }
 0x1e0   : > { %v1904_v30 = vpop.f32.mrf.mxu1  ;;  %3980 = vmatmul.mubr.bf16.gmra.mxu0 %v2441_v58 }
 0x1e1   : > { %v1905_v21 = vadd.f32 %v4709_v4, %v1904_v30  ;;  %v2331_v33 = vmax.f32 %v1913_v63, 0.0 }
 0x1e2   : > { %v3845_v46 = vpop.f32.mrf.mxu1 }
 0x1e3   : > { %v2329_v31 = vmax.f32 %v1905_v21, 0.0  ;;  %v2443_v15 = vpack.c.bf16 %v2331_v33, %v2330_v55  ;;  %v1926_v8 = vadd.f32 %v3845_v46, %v4709_v4 }
 0x1e4   : > { %v1917_v25 = vpop.f32.mrf.mxu1 }
 0x1e5   : > { %v2442_v7 = vpack.c.bf16 %v2329_v31, %v2328_v5  ;;  %v1918_v0 = vadd.f32 %v4709_v4, %v1917_v25  ;;  %v2334_v18 = vmax.f32 %v1926_v8, 0.0 }
 0x1e6   : > { %v3846_v44 = vpop.f32.mrf.mxu1 }
 0x1e7   : > { %v1929_v56 = vadd.f32 %v3846_v44, %v4709_v4  ;;  %3983 = vmatprep.mubr.bf16.mxu0 %v2442_v7  ;;  %v2332_v39 = vmax.f32 %v1918_v0, 0.0 }
 0x1e8   : > { %v1920_v20 = vpop.f32.mrf.mxu1  ;;  %3984 = vmatmul.mubr.bf16.gmra.mxu0 %v2443_v15 }
 0x1e9   : > { %v1921_v11 = vadd.f32 %v4709_v4, %v1920_v20  ;;  %v2335_v6 = vmax.f32 %v1929_v56, 0.0 }
 0x1ea   : > { %v3849_v45 = vpop.f32.mrf.mxu1 }
 0x1eb   : > { %v2333_v62 = vmax.f32 %v1921_v11, 0.0  ;;  %v2445_v52 = vpack.c.bf16 %v2335_v6, %v2334_v18  ;;  %v1942_v17 = vadd.f32 %v3849_v45, %v4709_v4 }
 0x1ec   : > { %v1933_v36 = vpop.f32.mrf.mxu1 }
 0x1ed   : > { %v2444_v49 = vpack.c.bf16 %v2333_v62, %v2332_v39  ;;  %v1934_v48 = vadd.f32 %v4709_v4, %v1933_v36  ;;  %v2338_v61 = vmax.f32 %v1942_v17, 0.0 }
 0x1ee   : > { %v3850_v19 = vpop.f32.mrf.mxu1 }
 0x1ef   : > { %v1945_v29 = vadd.f32 %v3850_v19, %v4709_v4  ;;  %3987 = vmatprep.mubr.bf16.mxu0 %v2444_v49  ;;  %v2336_v1 = vmax.f32 %v1934_v48, 0.0 }
 0x1f0   : > { %v1936_v41 = vpop.f32.mrf.mxu1  ;;  %3988 = vmatmul.mubr.bf16.gmra.mxu0 %v2445_v52 }
 0x1f1   : > { %v1937_v43 = vadd.f32 %v4709_v4, %v1936_v41  ;;  %v2339_v51 = vmax.f32 %v1945_v29, 0.0 }
 0x1f2   : > { %v3853_v26 = vpop.f32.mrf.mxu1 }
 0x1f3   : > { %v2337_v12 = vmax.f32 %v1937_v43, 0.0  ;;  %v2447_v28 = vpack.c.bf16 %v2339_v51, %v2338_v61  ;;  %v1958_v32 = vadd.f32 %v3853_v26, %v4709_v4 }
 0x1f4   : > { %v1949_v3 = vpop.f32.mrf.mxu1 }
 0x1f5   : > { %v2446_v27 = vpack.c.bf16 %v2337_v12, %v2336_v1  ;;  %v1950_v38 = vadd.f32 %v4709_v4, %v1949_v3  ;;  %v2342_v37 = vmax.f32 %v1958_v32, 0.0 }
 0x1f6   : > { %v3854_v34 = vpop.f32.mrf.mxu1 }
 0x1f7   : > { %v1961_v13 = vadd.f32 %v3854_v34, %v4709_v4  ;;  %3991 = vmatprep.mubr.bf16.mxu0 %v2446_v27  ;;  %v2340_v35 = vmax.f32 %v1950_v38, 0.0 }
 0x1f8   : > { %v1952_v2 = vpop.f32.mrf.mxu1  ;;  %3992 = vmatmul.mubr.bf16.gmra.mxu0 %v2447_v28 }
 0x1f9   : > { %v1953_v60 = vadd.f32 %v4709_v4, %v1952_v2  ;;  %v2343_v40 = vmax.f32 %v1961_v13, 0.0 }
 0x1fa   : > { %v3857_v54 = vpop.f32.mrf.mxu1 }
 0x1fb   : > { %v2341_v9 = vmax.f32 %v1953_v60, 0.0  ;;  %v2449_v47 = vpack.c.bf16 %v2343_v40, %v2342_v37  ;;  %v1974_v10 = vadd.f32 %v3857_v54, %v4709_v4 }
 0x1fc   : > { %v1965_v23 = vpop.f32.mrf.mxu1 }
 0x1fd   : > { %v2448_v42 = vpack.c.bf16 %v2341_v9, %v2340_v35  ;;  %v1966_v16 = vadd.f32 %v4709_v4, %v1965_v23  ;;  %v2346_v53 = vmax.f32 %v1974_v10, 0.0 }
 0x1fe   : > { %v3858_v59 = vpop.f32.mrf.mxu1 }
 0x1ff   : > { %v1977_v50 = vadd.f32 %v3858_v59, %v4709_v4  ;;  %3995 = vmatprep.mubr.bf16.mxu0 %v2448_v42  ;;  %v2344_v22 = vmax.f32 %v1966_v16, 0.0 }
 0x200   : > { %v1968_v24 = vpop.f32.mrf.mxu1  ;;  %3996 = vmatmul.mubr.bf16.gmra.mxu0 %v2449_v47 }
 0x201   : > { %v1969_v57 = vadd.f32 %v4709_v4, %v1968_v24  ;;  %v2347_v58 = vmax.f32 %v1977_v50, 0.0 }
 0x202   : > { %v3861_v14 = vpop.f32.mrf.mxu1 }
 0x203   : > { %v2345_v63 = vmax.f32 %v1969_v57, 0.0  ;;  %v2451_v33 = vpack.c.bf16 %v2347_v58, %v2346_v53  ;;  %v1990_v55 = vadd.f32 %v3861_v14, %v4709_v4 }
 0x204   : > { %v1981_v30 = vpop.f32.mrf.mxu1 }
 0x205   : > { %v2450_v21 = vpack.c.bf16 %v2345_v63, %v2344_v22  ;;  %v1982_v5 = vadd.f32 %v4709_v4, %v1981_v30  ;;  %v2350_v8 = vmax.f32 %v1990_v55, 0.0 }
 0x206   : > { %v3862_v46 = vpop.f32.mrf.mxu1 }
 0x207   : > { %v1993_v31 = vadd.f32 %v3862_v46, %v4709_v4  ;;  %3999 = vmatprep.mubr.bf16.mxu0 %v2450_v21  ;;  %v2348_v0 = vmax.f32 %v1982_v5, 0.0 }
 0x208   : > { %v1984_v25 = vpop.f32.mrf.mxu1  ;;  %4000 = vmatmul.mubr.bf16.gmra.mxu0 %v2451_v33 }
 0x209   : > { %v1985_v7 = vadd.f32 %v4709_v4, %v1984_v25  ;;  %v2351_v15 = vmax.f32 %v1993_v31, 0.0 }
 0x20a   : > { %v3865_v44 = vpop.f32.mrf.mxu1 }
 0x20b   : > { %v2349_v56 = vmax.f32 %v1985_v7, 0.0  ;;  %v2453_v6 = vpack.c.bf16 %v2351_v15, %v2350_v8  ;;  %v2006_v18 = vadd.f32 %v3865_v44, %v4709_v4 }
 0x20c   : > { %v1997_v20 = vpop.f32.mrf.mxu1 }
 0x20d   : > { %v2452_v11 = vpack.c.bf16 %v2349_v56, %v2348_v0  ;;  %v1998_v39 = vadd.f32 %v4709_v4, %v1997_v20  ;;  %v2354_v17 = vmax.f32 %v2006_v18, 0.0 }
 0x20e   : > { %v3866_v45 = vpop.f32.mrf.mxu1 }
 0x20f   : > { %v2009_v62 = vadd.f32 %v3866_v45, %v4709_v4  ;;  %4003 = vmatprep.mubr.bf16.mxu0 %v2452_v11  ;;  %v2352_v48 = vmax.f32 %v1998_v39, 0.0 }
 0x210   : > { %v2000_v36 = vpop.f32.mrf.mxu1  ;;  %4004 = vmatmul.mubr.bf16.gmra.mxu0 %v2453_v6 }
 0x211   : > { %v2001_v49 = vadd.f32 %v4709_v4, %v2000_v36  ;;  %v2355_v52 = vmax.f32 %v2009_v62, 0.0 }
 0x212   : > { %v3869_v19 = vpop.f32.mrf.mxu1 }
 0x213   : > { %v2353_v29 = vmax.f32 %v2001_v49, 0.0  ;;  %v2455_v51 = vpack.c.bf16 %v2355_v52, %v2354_v17  ;;  %v2022_v61 = vadd.f32 %v3869_v19, %v4709_v4 }
 0x214   : > { %v2013_v41 = vpop.f32.mrf.mxu1 }
 0x215   : > { %v2454_v43 = vpack.c.bf16 %v2353_v29, %v2352_v48  ;;  %v2014_v1 = vadd.f32 %v4709_v4, %v2013_v41  ;;  %v2358_v32 = vmax.f32 %v2022_v61, 0.0 }
 0x216   : > { %v3870_v26 = vpop.f32.mrf.mxu1 }
 0x217   : > { %v2025_v12 = vadd.f32 %v3870_v26, %v4709_v4  ;;  %4007 = vmatprep.mubr.bf16.mxu0 %v2454_v43  ;;  %v2356_v38 = vmax.f32 %v2014_v1, 0.0 }
 0x218   : > { %v2016_v3 = vpop.f32.mrf.mxu1  ;;  %4008 = vmatmul.mubr.bf16.gmra.mxu0 %v2455_v51 }
 0x219   : > { %v2017_v27 = vadd.f32 %v4709_v4, %v2016_v3  ;;  %v2359_v28 = vmax.f32 %v2025_v12, 0.0 }
 0x21a   : > { %v3873_v34 = vpop.f32.mrf.mxu1 }
 0x21b   : > { %v2357_v13 = vmax.f32 %v2017_v27, 0.0  ;;  %v2457_v40 = vpack.c.bf16 %v2359_v28, %v2358_v32  ;;  %v2038_v37 = vadd.f32 %v3873_v34, %v4709_v4 }
 0x21c   : > { %v2029_v2 = vpop.f32.mrf.mxu1 }
 0x21d   : > { %v2456_v60 = vpack.c.bf16 %v2357_v13, %v2356_v38  ;;  %v2030_v35 = vadd.f32 %v4709_v4, %v2029_v2  ;;  %v2362_v10 = vmax.f32 %v2038_v37, 0.0 }
 0x21e   : > { %v3874_v54 = vpop.f32.mrf.mxu1 }
 0x21f   : > { %v2041_v9 = vadd.f32 %v3874_v54, %v4709_v4  ;;  %4011 = vmatprep.mubr.bf16.mxu0 %v2456_v60  ;;  %v2360_v16 = vmax.f32 %v2030_v35, 0.0 }
 0x220   : > { %v2032_v23 = vpop.f32.mrf.mxu1  ;;  %4012 = vmatmul.mubr.bf16.gmra.mxu0 %v2457_v40 }
 0x221   : > { %v2033_v42 = vadd.f32 %v4709_v4, %v2032_v23  ;;  %v2363_v47 = vmax.f32 %v2041_v9, 0.0 }
 0x222   : > { %v3877_v59 = vpop.f32.mrf.mxu1 }
 0x223   : > { %v2361_v50 = vmax.f32 %v2033_v42, 0.0  ;;  %v2459_v58 = vpack.c.bf16 %v2363_v47, %v2362_v10  ;;  %v2054_v53 = vadd.f32 %v3877_v59, %v4709_v4 }
 0x224   : > { %v2045_v24 = vpop.f32.mrf.mxu1 }
 0x225   : > { %v2458_v57 = vpack.c.bf16 %v2361_v50, %v2360_v16  ;;  %v2046_v22 = vadd.f32 %v4709_v4, %v2045_v24  ;;  %v2366_v55 = vmax.f32 %v2054_v53, 0.0 }
 0x226   : > { %v3878_v14 = vpop.f32.mrf.mxu1 }
 0x227   : > { %v2057_v63 = vadd.f32 %v3878_v14, %v4709_v4  ;;  %4015 = vmatprep.mubr.bf16.mxu0 %v2458_v57  ;;  %v2364_v5 = vmax.f32 %v2046_v22, 0.0 }
 0x228   : > { %v2048_v30 = vpop.f32.mrf.mxu1  ;;  %4016 = vmatmul.mubr.bf16.gmra.mxu0 %v2459_v58 }
 0x229   : > { %v2049_v21 = vadd.f32 %v4709_v4, %v2048_v30  ;;  %v2367_v33 = vmax.f32 %v2057_v63, 0.0 }
 0x22a   : > { %v3881_v46 = vpop.f32.mrf.mxu1 }
 0x22b   : > { %v2365_v31 = vmax.f32 %v2049_v21, 0.0  ;;  %v2461_v15 = vpack.c.bf16 %v2367_v33, %v2366_v55  ;;  %v2070_v8 = vadd.f32 %v3881_v46, %v4709_v4 }
 0x22c   : > { %v2061_v25 = vpop.f32.mrf.mxu1 }
 0x22d   : > { %v2460_v7 = vpack.c.bf16 %v2365_v31, %v2364_v5  ;;  %v2062_v0 = vadd.f32 %v4709_v4, %v2061_v25  ;;  %v2370_v18 = vmax.f32 %v2070_v8, 0.0 }
 0x22e   : > { %v3882_v44 = vpop.f32.mrf.mxu1 }
 0x22f   : > { %v2073_v56 = vadd.f32 %v3882_v44, %v4709_v4  ;;  %4019 = vmatprep.mubr.bf16.mxu0 %v2460_v7  ;;  %v2368_v39 = vmax.f32 %v2062_v0, 0.0 }
 0x230   : > { %v2064_v20 = vpop.f32.mrf.mxu1  ;;  %4020 = vmatmul.mubr.bf16.gmra.mxu0 %v2461_v15 }
 0x231   : > { %v2065_v11 = vadd.f32 %v4709_v4, %v2064_v20  ;;  %v2371_v6 = vmax.f32 %v2073_v56, 0.0 }
 0x232   : > { %v3885_v45 = vpop.f32.mrf.mxu1 }
 0x233   : > { %v2369_v62 = vmax.f32 %v2065_v11, 0.0  ;;  %v2463_v52 = vpack.c.bf16 %v2371_v6, %v2370_v18  ;;  %v2086_v17 = vadd.f32 %v3885_v45, %v4709_v4 }
 0x234   : > { %v2077_v36 = vpop.f32.mrf.mxu1 }
 0x235   : > { %v2462_v49 = vpack.c.bf16 %v2369_v62, %v2368_v39  ;;  %v2078_v48 = vadd.f32 %v4709_v4, %v2077_v36  ;;  %v2374_v61 = vmax.f32 %v2086_v17, 0.0 }
 0x236   : > { %v3886_v19 = vpop.f32.mrf.mxu1 }
 0x237   : > { %v2089_v29 = vadd.f32 %v3886_v19, %v4709_v4  ;;  %4023 = vmatprep.mubr.bf16.mxu0 %v2462_v49  ;;  %v2372_v1 = vmax.f32 %v2078_v48, 0.0 }
 0x238   : > { %v2080_v41 = vpop.f32.mrf.mxu1  ;;  %4024 = vmatmul.mubr.bf16.gmra.mxu0 %v2463_v52 }
 0x239   : > { %v2081_v43 = vadd.f32 %v4709_v4, %v2080_v41  ;;  %v2375_v51 = vmax.f32 %v2089_v29, 0.0 }
 0x23a   : > { %v3889_v26 = vpop.f32.mrf.mxu1 }
 0x23b   : > { %v2373_v12 = vmax.f32 %v2081_v43, 0.0  ;;  %v2465_v28 = vpack.c.bf16 %v2375_v51, %v2374_v61  ;;  %v2102_v32 = vadd.f32 %v3889_v26, %v4709_v4 }
 0x23c   : > { %v2093_v3 = vpop.f32.mrf.mxu1 }
 0x23d   : > { %v2464_v27 = vpack.c.bf16 %v2373_v12, %v2372_v1  ;;  %v2094_v38 = vadd.f32 %v4709_v4, %v2093_v3  ;;  %v2378_v37 = vmax.f32 %v2102_v32, 0.0 }
 0x23e   : > { %v3890_v34 = vpop.f32.mrf.mxu1 }
 0x23f   : > { %v2105_v13 = vadd.f32 %v3890_v34, %v4709_v4  ;;  %4027 = vmatprep.mubr.bf16.mxu0 %v2464_v27  ;;  %v2376_v35 = vmax.f32 %v2094_v38, 0.0 }
 0x240   : > { %v2096_v2 = vpop.f32.mrf.mxu1  ;;  %4028 = vmatmul.mubr.bf16.gmra.mxu0 %v2465_v28 }
 0x241   : > { %v2097_v60 = vadd.f32 %v4709_v4, %v2096_v2  ;;  %v2379_v40 = vmax.f32 %v2105_v13, 0.0 }
 0x242   : > { %v3893_v54 = vpop.f32.mrf.mxu1 }
 0x243   : > { %v2377_v9 = vmax.f32 %v2097_v60, 0.0  ;;  %v2467_v47 = vpack.c.bf16 %v2379_v40, %v2378_v37  ;;  %v2118_v10 = vadd.f32 %v3893_v54, %v4709_v4 }
 0x244   : > { %v2109_v23 = vpop.f32.mrf.mxu1 }
 0x245   : > { %v2466_v42 = vpack.c.bf16 %v2377_v9, %v2376_v35  ;;  %v2110_v16 = vadd.f32 %v4709_v4, %v2109_v23  ;;  %v2382_v53 = vmax.f32 %v2118_v10, 0.0 }
 0x246   : > { %v3894_v59 = vpop.f32.mrf.mxu1 }
 0x247   : > { %v2121_v50 = vadd.f32 %v3894_v59, %v4709_v4  ;;  %4031 = vmatprep.mubr.bf16.mxu0 %v2466_v42  ;;  %v2380_v22 = vmax.f32 %v2110_v16, 0.0 }
 0x248   : > { %v2112_v24 = vpop.f32.mrf.mxu1  ;;  %4032 = vmatmul.mubr.bf16.gmra.mxu0 %v2467_v47 }
 0x249   : > { %v2113_v57 = vadd.f32 %v4709_v4, %v2112_v24  ;;  %v2383_v58 = vmax.f32 %v2121_v50, 0.0 }
 0x24a   : > { %v3897_v14 = vpop.f32.mrf.mxu1 }
 0x24b   : > { %v2381_v63 = vmax.f32 %v2113_v57, 0.0  ;;  %v2469_v33 = vpack.c.bf16 %v2383_v58, %v2382_v53  ;;  %v2134_v55 = vadd.f32 %v3897_v14, %v4709_v4 }
 0x24c   : > { %v2125_v30 = vpop.f32.mrf.mxu1 }
 0x24d   : > { %v2468_v21 = vpack.c.bf16 %v2381_v63, %v2380_v22  ;;  %v2126_v5 = vadd.f32 %v4709_v4, %v2125_v30  ;;  %v2386_v8 = vmax.f32 %v2134_v55, 0.0  ;;  %v4864_v22 = vld [vmem:[%s5297_s6] ss:$0 sm:$0xff] }
 0x24e   : > { %v3898_v46 = vpop.f32.mrf.mxu1 }
 0x24f   : > { %v2137_v31 = vadd.f32 %v3898_v46, %v4709_v4  ;;  %4035 = vmatprep.mubr.bf16.mxu0 %v2468_v21  ;;  %v2384_v0 = vmax.f32 %v2126_v5, 0.0 }
 0x250   : > { %v2128_v25 = vpop.f32.mrf.mxu1  ;;  %4036 = vmatmul.mubr.bf16.gmra.mxu0 %v2469_v33 }
 0x251   : > { %v2129_v7 = vadd.f32 %v4709_v4, %v2128_v25  ;;  %v2387_v15 = vmax.f32 %v2137_v31, 0.0 }
 0x252   : > { %v3901_v44 = vpop.f32.mrf.mxu1 }
 0x253   : > { %v2385_v56 = vmax.f32 %v2129_v7, 0.0  ;;  %v2471_v6 = vpack.c.bf16 %v2387_v15, %v2386_v8  ;;  %v2150_v18 = vadd.f32 %v3901_v44, %v4709_v4 }
 0x254   : > { %v2141_v20 = vpop.f32.mrf.mxu1 }
 0x255   : > { %v2470_v11 = vpack.c.bf16 %v2385_v56, %v2384_v0  ;;  %v2142_v39 = vadd.f32 %v4709_v4, %v2141_v20  ;;  %v2390_v17 = vmax.f32 %v2150_v18, 0.0 }
 0x256   : > { %v3902_v45 = vpop.f32.mrf.mxu1 }
 0x257   : > { %v2153_v62 = vadd.f32 %v3902_v45, %v4709_v4  ;;  %4039 = vmatprep.mubr.bf16.mxu0 %v2470_v11  ;;  %v2388_v48 = vmax.f32 %v2142_v39, 0.0 }
 0x258   : > { %v2144_v36 = vpop.f32.mrf.mxu1  ;;  %4040 = vmatmul.mubr.bf16.gmra.mxu0 %v2471_v6 }
 0x259   : > { %v2145_v49 = vadd.f32 %v4709_v4, %v2144_v36  ;;  %v2391_v52 = vmax.f32 %v2153_v62, 0.0 }
 0x25a   : > { %v3905_v19 = vpop.f32.mrf.mxu1 }
 0x25b   : > { %v2389_v29 = vmax.f32 %v2145_v49, 0.0  ;;  %v2473_v51 = vpack.c.bf16 %v2391_v52, %v2390_v17  ;;  %v2166_v61 = vadd.f32 %v3905_v19, %v4709_v4 }
 0x25c   : > { %v2157_v41 = vpop.f32.mrf.mxu1 }
 0x25d   : > { %v2472_v43 = vpack.c.bf16 %v2389_v29, %v2388_v48  ;;  %v2158_v1 = vadd.f32 %v4709_v4, %v2157_v41  ;;  %v2394_v32 = vmax.f32 %v2166_v61, 0.0 }
 0x25e   : > { %v3906_v26 = vpop.f32.mrf.mxu1 }
 0x25f   : > { %v2169_v12 = vadd.f32 %v3906_v26, %v4709_v4  ;;  %4043 = vmatprep.mubr.bf16.mxu0 %v2472_v43  ;;  %v2392_v38 = vmax.f32 %v2158_v1, 0.0 }
 0x260   : > { %v2160_v3 = vpop.f32.mrf.mxu1  ;;  %4044 = vmatmul.mubr.bf16.gmra.mxu0 %v2473_v51 }
 0x261   : > { %v2161_v27 = vadd.f32 %v4709_v4, %v2160_v3  ;;  %v2395_v28 = vmax.f32 %v2169_v12, 0.0 }
 0x262   : > { %v3909_v34 = vpop.f32.mrf.mxu1 }
 0x263   : > { %v2393_v13 = vmax.f32 %v2161_v27, 0.0  ;;  %v2475_v40 = vpack.c.bf16 %v2395_v28, %v2394_v32  ;;  %v2182_v37 = vadd.f32 %v3909_v34, %v4709_v4 }
 0x264   : > { %v2173_v2 = vpop.f32.mrf.mxu1 }
 0x265   : > { %v2474_v60 = vpack.c.bf16 %v2393_v13, %v2392_v38  ;;  %v2174_v35 = vadd.f32 %v4709_v4, %v2173_v2  ;;  %v2398_v10 = vmax.f32 %v2182_v37, 0.0  ;;  %v4901_v13 = vld [vmem:[%s5295_s4] ss:$0 sm:$0xff] }
 0x266   : > { %v3910_v54 = vpop.f32.mrf.mxu1 }
 0x267   : > { %v2185_v9 = vadd.f32 %v3910_v54, %v4709_v4  ;;  %4047 = vmatprep.mubr.bf16.mxu0 %v2474_v60  ;;  %v2396_v16 = vmax.f32 %v2174_v35, 0.0 }
 0x268   : > { %v2176_v23 = vpop.f32.mrf.mxu1  ;;  %4048 = vmatmul.mubr.bf16.gmra.mxu0 %v2475_v40 }
 0x269   : > { %v2177_v42 = vadd.f32 %v4709_v4, %v2176_v23  ;;  %v2399_v47 = vmax.f32 %v2185_v9, 0.0 }
 0x26a   : > { %v3913_v59 = vpop.f32.mrf.mxu1 }
 0x26b   : > { %v2397_v50 = vmax.f32 %v2177_v42, 0.0  ;;  %v2477_v58 = vpack.c.bf16 %v2399_v47, %v2398_v10  ;;  %v2198_v30 = vadd.f32 %v3913_v59, %v4709_v4 }
 0x26c   : > { %v2189_v24 = vpop.f32.mrf.mxu1 }
 0x26d   : > { %v2476_v57 = vpack.c.bf16 %v2397_v50, %v2396_v16  ;;  %v2190_v63 = vadd.f32 %v4709_v4, %v2189_v24  ;;  %v2402_v0 = vmax.f32 %v2198_v30, 0.0 }
 0x26e   : > { %v3914_v14 = vpop.f32.mrf.mxu1 }
 0x26f   : > { %v2201_v53 = vadd.f32 %v3914_v14, %v4709_v4  ;;  %4051 = vmatprep.mubr.bf16.mxu0 %v2476_v57  ;;  %v2400_v7 = vmax.f32 %v2190_v63, 0.0 }
 0x270   : > { %v2192_v21 = vpop.f32.mrf.mxu1  ;;  %v3957_v33 = vpop.f32.mrf.mxu0  ;;  %4052 = vmatmul.mubr.bf16.gmra.mxu0 %v2477_v58 }
 0x271   : > { %v2193_v46 = vadd.f32 %v4709_v4, %v2192_v21  ;;  %v2606_v5 = vadd.f32 %v3957_v33, %v4864_v22  ;;  %v2403_v31 = vmax.f32 %v2201_v53, 0.0 }
 0x272   : > { %v3917_v55 = vpop.f32.mrf.mxu1  ;;  %v2597_v25 = vpop.f32.mrf.mxu0 }
 0x273   : > { %v2401_v15 = vmax.f32 %v2193_v46, 0.0  ;;  %3111 = vst.msk [vmem:[%s4872_s13 + $0x10] sm:$0xff] %vm3108_vm1, %v2606_v5  ;;  %v2598_v44 = vadd.f32 %v4864_v22, %v2597_v25  ;;  %v2479_v6 = vpack.c.bf16 %v2403_v31, %v2402_v0  ;;  %v2214_v49 = vadd.f32 %v3917_v55, %v4709_v4 }
 0x274   : > { %v2205_v56 = vpop.f32.mrf.mxu1  ;;  %v3958_v8 = vpop.f32.mrf.mxu0 }
 0x275   : > { %v2478_v20 = vpack.c.bf16 %v2401_v15, %v2400_v7  ;;  %3109 = vst.msk [vmem:[%s4872_s13] sm:$0xff] %vm3108_vm1, %v2598_v44  ;;  %v2609_v11 = vadd.f32 %v3958_v8, %v4864_v22  ;;  %v2206_v62 = vadd.f32 %v4709_v4, %v2205_v56  ;;  %v2406_v12 = vmax.f32 %v2214_v49, 0.0 }
 0x276   : > { %v3918_v45 = vpop.f32.mrf.mxu1  ;;  %v2600_v39 = vpop.f32.mrf.mxu0 }
 0x277   : > { %3112 = vst.msk [vmem:[%s4872_s13 + $0x18] sm:$0xff] %vm3108_vm1, %v2609_v11  ;;  %v2217_v18 = vadd.f32 %v3918_v45, %v4709_v4  ;;  %v2601_v36 = vadd.f32 %v4864_v22, %v2600_v39  ;;  %4055 = vmatprep.mubr.bf16.mxu0 %v2478_v20  ;;  %v2404_v51 = vmax.f32 %v2206_v62, 0.0 }
 0x278   : > { %v2208_v52 = vpop.f32.mrf.mxu1  ;;  %v3961_v19 = vpop.f32.mrf.mxu0  ;;  %4056 = vmatmul.mubr.bf16.gmra.mxu0 %v2479_v6 }
 0x279   : > { %3110 = vst.msk [vmem:[%s4872_s13 + $0x8] sm:$0xff] %vm3108_vm1, %v2601_v36  ;;  %v2209_v48 = vadd.f32 %v4709_v4, %v2208_v52  ;;  %v2622_v29 = vadd.f32 %v3961_v19, %v4864_v22  ;;  %v2407_v17 = vmax.f32 %v2217_v18, 0.0 }
 0x27a   : > { %v3921_v41 = vpop.f32.mrf.mxu1  ;;  %v2613_v43 = vpop.f32.mrf.mxu0 }
 0x27b   : > { %v2405_v26 = vmax.f32 %v2209_v48, 0.0  ;;  %3115 = vst.msk [vmem:[%s4872_s13 + $0x30] sm:$0xff] %vm3108_vm1, %v2622_v29  ;;  %v2614_v1 = vadd.f32 %v4864_v22, %v2613_v43  ;;  %v2481_v28 = vpack.c.bf16 %v2407_v17, %v2406_v12  ;;  %v2230_v40 = vadd.f32 %v4901_v13, %v3921_v41 }
 0x27c   : > { %v2221_v61 = vpop.f32.mrf.mxu1  ;;  %v3962_v3 = vpop.f32.mrf.mxu0 }
 0x27d   : > { %v2480_v27 = vpack.c.bf16 %v2405_v26, %v2404_v51  ;;  %3113 = vst.msk [vmem:[%s4872_s13 + $0x20] sm:$0xff] %vm3108_vm1, %v2614_v1  ;;  %v2625_v4 = vadd.f32 %v3962_v3, %v4864_v22  ;;  %v2222_v32 = vadd.f32 %v4901_v13, %v2221_v61  ;;  %v2410_v10 = vmax.f32 %v2230_v40, 0.0 }
 0x27e   : > { %v3922_v34 = vpop.f32.mrf.mxu1  ;;  %v2616_v38 = vpop.f32.mrf.mxu0 }
 0x27f   : > { %3116 = vst.msk [vmem:[%s4872_s13 + $0x38] sm:$0xff] %vm3108_vm1, %v2625_v4  ;;  %v2233_v2 = vadd.f32 %v4901_v13, %v3922_v34  ;;  %v2617_v60 = vadd.f32 %v4864_v22, %v2616_v38  ;;  %4059 = vmatprep.mubr.bf16.mxu0 %v2480_v27  ;;  %v2408_v59 = vmax.f32 %v2222_v32, 0.0 }
 0x280   : > { %v2224_v54 = vpop.f32.mrf.mxu1  ;;  %v3965_v35 = vpop.f32.mrf.mxu0  ;;  %4060 = vmatmul.mubr.bf16.gmra.mxu0 %v2481_v28 }
 0x281   : > { %3114 = vst.msk [vmem:[%s4872_s13 + $0x28] sm:$0xff] %vm3108_vm1, %v2617_v60  ;;  %v2225_v9 = vadd.f32 %v4901_v13, %v2224_v54  ;;  %v2638_v37 = vadd.f32 %v3965_v35, %v4864_v22  ;;  %v2411_v23 = vmax.f32 %v2233_v2, 0.0 }
 0x282   : > { %v3925_v42 = vpop.f32.mrf.mxu1  ;;  %v2629_v47 = vpop.f32.mrf.mxu0 }
 0x283   : > { %v2409_v16 = vmax.f32 %v2225_v9, 0.0  ;;  %3119 = vst.msk [vmem:[%s4872_s13 + $0x50] sm:$0xff] %vm3108_vm1, %v2638_v37  ;;  %v2630_v50 = vadd.f32 %v4864_v22, %v2629_v47  ;;  %v2483_v63 = vpack.c.bf16 %v2411_v23, %v2410_v10  ;;  %v2246_v5 = vadd.f32 %v4901_v13, %v3925_v42 }
 0x284   : > { %v2237_v24 = vpop.f32.mrf.mxu1  ;;  %v3966_v57 = vpop.f32.mrf.mxu0 }
 0x285   : > { %v2482_v58 = vpack.c.bf16 %v2409_v16, %v2408_v59  ;;  %3117 = vst.msk [vmem:[%s4872_s13 + $0x40] sm:$0xff] %vm3108_vm1, %v2630_v50  ;;  %v2641_v14 = vadd.f32 %v3966_v57, %v4864_v22  ;;  %v2238_v21 = vadd.f32 %v4901_v13, %v2237_v24  ;;  %v2414_v11 = vmax.f32 %v2246_v5, 0.0 }
 0x286   : > { %v3926_v53 = vpop.f32.mrf.mxu1  ;;  %v2632_v30 = vpop.f32.mrf.mxu0 }
 0x287   : > { %3120 = vst.msk [vmem:[%s4872_s13 + $0x58] sm:$0xff] %vm3108_vm1, %v2641_v14  ;;  %v2249_v33 = vadd.f32 %v4901_v13, %v3926_v53  ;;  %v2633_v46 = vadd.f32 %v4864_v22, %v2632_v30  ;;  %4063 = vmatprep.mubr.bf16.mxu0 %v2482_v58  ;;  %v2412_v56 = vmax.f32 %v2238_v21, 0.0 }
 0x288   : > { %v2240_v31 = vpop.f32.mrf.mxu1  ;;  %v3969_v55 = vpop.f32.mrf.mxu0  ;;  %4064 = vmatmul.mubr.bf16.gmra.mxu0 %v2483_v63 }
 0x289   : > { %3118 = vst.msk [vmem:[%s4872_s13 + $0x48] sm:$0xff] %vm3108_vm1, %v2633_v46  ;;  %v2241_v25 = vadd.f32 %v4901_v13, %v2240_v31  ;;  %v2654_v7 = vadd.f32 %v3969_v55, %v4864_v22  ;;  %v2415_v15 = vmax.f32 %v2249_v33, 0.0 }
 0x28a   : > { %v3929_v44 = vpop.f32.mrf.mxu1  ;;  %v2645_v0 = vpop.f32.mrf.mxu0 }
 0x28b   : > { %v2413_v8 = vmax.f32 %v2241_v25, 0.0  ;;  %3123 = vst.msk [vmem:[%s4872_s13 + $0x70] sm:$0xff] %vm3108_vm1, %v2654_v7  ;;  %v2646_v20 = vadd.f32 %v4864_v22, %v2645_v0  ;;  %v2485_v18 = vpack.c.bf16 %v2415_v15, %v2414_v11  ;;  %v2262_v29 = vadd.f32 %v4901_v13, %v3929_v44 }
 0x28c   : > { %v2253_v6 = vpop.f32.mrf.mxu1  ;;  %v3970_v45 = vpop.f32.mrf.mxu0 }
 0x28d   : > { %v2484_v39 = vpack.c.bf16 %v2413_v8, %v2412_v56  ;;  %3121 = vst.msk [vmem:[%s4872_s13 + $0x60] sm:$0xff] %vm3108_vm1, %v2646_v20  ;;  %v2657_v62 = vadd.f32 %v3970_v45, %v4864_v22  ;;  %v2254_v52 = vadd.f32 %v4901_v13, %v2253_v6  ;;  %v2418_v4 = vmax.f32 %v2262_v29, 0.0 }
 0x28e   : > { %v3930_v36 = vpop.f32.mrf.mxu1  ;;  %v2648_v49 = vpop.f32.mrf.mxu0 }
 0x28f   : > { %3124 = vst.msk [vmem:[%s4872_s13 + $0x78] sm:$0xff] %vm3108_vm1, %v2657_v62  ;;  %v2265_v19 = vadd.f32 %v4901_v13, %v3930_v36  ;;  %v2649_v48 = vadd.f32 %v4864_v22, %v2648_v49  ;;  %4067 = vmatprep.mubr.bf16.mxu0 %v2484_v39  ;;  %v2416_v61 = vmax.f32 %v2254_v52, 0.0 }
 0x290   : > { %v2256_v17 = vpop.f32.mrf.mxu1  ;;  %v3973_v41 = vpop.f32.mrf.mxu0  ;;  %4068 = vmatmul.mubr.bf16.gmra.mxu0 %v2485_v18 }
 0x291   : > { %3122 = vst.msk [vmem:[%s4872_s13 + $0x68] sm:$0xff] %vm3108_vm1, %v2649_v48  ;;  %v2257_v43 = vadd.f32 %v4901_v13, %v2256_v17  ;;  %v2670_v51 = vadd.f32 %v3973_v41, %v4864_v22  ;;  %v2419_v26 = vmax.f32 %v2265_v19, 0.0 }
 0x292   : > { %v3933_v1 = vpop.f32.mrf.mxu1  ;;  %v2661_v12 = vpop.f32.mrf.mxu0 }
 0x293   : > { %v2417_v3 = vmax.f32 %v2257_v43, 0.0  ;;  %3127 = vst.msk [vmem:[%s4872_s13 + $0x90] sm:$0xff] %vm3108_vm1, %v2670_v51  ;;  %v2662_v27 = vadd.f32 %v4864_v22, %v2661_v12  ;;  %v2487_v2 = vpack.c.bf16 %v2419_v26, %v2418_v4  ;;  %v2278_v37 = vadd.f32 %v4901_v13, %v3933_v1 }
 0x294   : > { %v2269_v28 = vpop.f32.mrf.mxu1  ;;  %v3974_v34 = vpop.f32.mrf.mxu0 }
 0x295   : > { %v2486_v38 = vpack.c.bf16 %v2417_v3, %v2416_v61  ;;  %3125 = vst.msk [vmem:[%s4872_s13 + $0x80] sm:$0xff] %vm3108_vm1, %v2662_v27  ;;  %v2673_v32 = vadd.f32 %v3974_v34, %v4864_v22  ;;  %v2270_v54 = vadd.f32 %v4901_v13, %v2269_v28  ;;  %v2422_v14 = vmax.f32 %v2278_v37, 0.0 }
 0x296   : > { %v3934_v60 = vpop.f32.mrf.mxu1  ;;  %v2664_v40 = vpop.f32.mrf.mxu0 }
 0x297   : > { %3128 = vst.msk [vmem:[%s4872_s13 + $0x98] sm:$0xff] %vm3108_vm1, %v2673_v32  ;;  %v2281_v35 = vadd.f32 %v4901_v13, %v3934_v60  ;;  %v2665_v9 = vadd.f32 %v4864_v22, %v2664_v40  ;;  %4071 = vmatprep.mubr.bf16.mxu0 %v2486_v38  ;;  %v2420_v24 = vmax.f32 %v2270_v54, 0.0 }
 0x298   : > { %v2272_v23 = vpop.f32.mrf.mxu1  ;;  %v3977_v42 = vpop.f32.mrf.mxu0  ;;  %4072 = vmatmul.mubr.bf16.gmra.mxu0 %v2487_v2 }
 0x299   : > { %3126 = vst.msk [vmem:[%s4872_s13 + $0x88] sm:$0xff] %vm3108_vm1, %v2665_v9  ;;  %v2273_v47 = vadd.f32 %v4901_v13, %v2272_v23  ;;  %v2686_v59 = vadd.f32 %v3977_v42, %v4864_v22  ;;  %v2423_v16 = vmax.f32 %v2281_v35, 0.0 }
 0x29a   : > { %v3937_v50 = vpop.f32.mrf.mxu1  ;;  %v2677_v10 = vpop.f32.mrf.mxu0 }
 0x29b   : > { %v2421_v57 = vmax.f32 %v2273_v47, 0.0  ;;  %3131 = vst.msk [vmem:[%s4872_s13 + $0xb0] sm:$0xff] %vm3108_vm1, %v2686_v59  ;;  %v2678_v58 = vadd.f32 %v4864_v22, %v2677_v10  ;;  %v2489_v33 = vpack.c.bf16 %v2423_v16, %v2422_v14  ;;  %v2294_v7 = vadd.f32 %v4901_v13, %v3937_v50 }
 0x29c   : > { %v2285_v63 = vpop.f32.mrf.mxu1  ;;  %v3978_v53 = vpop.f32.mrf.mxu0 }
 0x29d   : > { %v2488_v30 = vpack.c.bf16 %v2421_v57, %v2420_v24  ;;  %3129 = vst.msk [vmem:[%s4872_s13 + $0xa0] sm:$0xff] %vm3108_vm1, %v2678_v58  ;;  %v2689_v21 = vadd.f32 %v3978_v53, %v4864_v22  ;;  %v2286_v31 = vadd.f32 %v4901_v13, %v2285_v63  ;;  %v2426_v39 = vmax.f32 %v2294_v7, 0.0 }
 0x29e   : > { %v3938_v46 = vpop.f32.mrf.mxu1  ;;  %v2680_v5 = vpop.f32.mrf.mxu0 }
 0x29f   : > { %3132 = vst.msk [vmem:[%s4872_s13 + $0xb8] sm:$0xff] %vm3108_vm1, %v2689_v21  ;;  %v2297_v55 = vadd.f32 %v4901_v13, %v3938_v46  ;;  %v2681_v25 = vadd.f32 %v4864_v22, %v2680_v5  ;;  %4075 = vmatprep.mubr.bf16.mxu0 %v2488_v30  ;;  %v2424_v11 = vmax.f32 %v2286_v31, 0.0 }
 0x2a0   : > { %v2288_v15 = vpop.f32.mrf.mxu1  ;;  %v3981_v44 = vpop.f32.mrf.mxu0  ;;  %4076 = vmatmul.mubr.bf16.gmra.mxu0 %v2489_v33 }
 0x2a1   : > { %3130 = vst.msk [vmem:[%s4872_s13 + $0xa8] sm:$0xff] %vm3108_vm1, %v2681_v25  ;;  %v2289_v0 = vadd.f32 %v4901_v13, %v2288_v15  ;;  %v2702_v56 = vadd.f32 %v3981_v44, %v4864_v22  ;;  %v2427_v8 = vmax.f32 %v2297_v55, 0.0 }
 0x2a2   : > { %v2693_v20 = vpop.f32.mrf.mxu0 }
 0x2a3   : > { %v2425_v6 = vmax.f32 %v2289_v0, 0.0  ;;  %3135 = vst.msk [vmem:[%s4872_s13 + $0xd0] sm:$0xff] %vm3108_vm1, %v2702_v56  ;;  %v2694_v45 = vadd.f32 %v4864_v22, %v2693_v20  ;;  %v2491_v36 = vpack.c.bf16 %v2427_v8, %v2426_v39 }
 0x2a4   : > { %v3982_v62 = vpop.f32.mrf.mxu0 }
 0x2a5   : > { %v2490_v18 = vpack.c.bf16 %v2425_v6, %v2424_v11  ;;  %3133 = vst.msk [vmem:[%s4872_s13 + $0xc0] sm:$0xff] %vm3108_vm1, %v2694_v45  ;;  %v2705_v13 = vadd.f32 %v3982_v62, %v4864_v22 }
 0x2a6   : > { %v2696_v49 = vpop.f32.mrf.mxu0 }
 0x2a7   : > { %3136 = vst.msk [vmem:[%s4872_s13 + $0xd8] sm:$0xff] %vm3108_vm1, %v2705_v13  ;;  %v2697_v52 = vadd.f32 %v4864_v22, %v2696_v49  ;;  %4079 = vmatprep.mubr.bf16.mxu0 %v2490_v18 }
 0x2a8   : > { %v3985_v19 = vpop.f32.mrf.mxu0  ;;  %4080 = vmatmul.mubr.bf16.gmra.mxu0 %v2491_v36 }
 0x2a9   : > { %3134 = vst.msk [vmem:[%s4872_s13 + $0xc8] sm:$0xff] %vm3108_vm1, %v2697_v52  ;;  %v2718_v48 = vadd.f32 %v3985_v19, %v4864_v22 }
 0x2aa   : > { %v2709_v29 = vpop.f32.mrf.mxu0 }
 0x2ab   : > { %3139 = vst.msk [vmem:[%s4872_s13 + $0xf0] sm:$0xff] %vm3108_vm1, %v2718_v48  ;;  %v2710_v17 = vadd.f32 %v4864_v22, %v2709_v29 }
 0x2ac   : > { %v3986_v41 = vpop.f32.mrf.mxu0 }
 0x2ad   : > { %3137 = vst.msk [vmem:[%s4872_s13 + $0xe0] sm:$0xff] %vm3108_vm1, %v2710_v17  ;;  %v2721_v43 = vadd.f32 %v3986_v41, %v4864_v22 }
 0x2ae   : > { %v2712_v51 = vpop.f32.mrf.mxu0 }
 0x2af   : > { %3140 = vst.msk [vmem:[%s4872_s13 + $0xf8] sm:$0xff] %vm3108_vm1, %v2721_v43  ;;  %v2713_v26 = vadd.f32 %v4864_v22, %v2712_v51 }
 0x2b0   : > { %v3989_v1 = vpop.f32.mrf.mxu0 }
 0x2b1   : > { %3138 = vst.msk [vmem:[%s4872_s13 + $0xe8] sm:$0xff] %vm3108_vm1, %v2713_v26  ;;  %v2734_v12 = vadd.f32 %v3989_v1, %v4864_v22 }
 0x2b2   : > { %v2725_v61 = vpop.f32.mrf.mxu0 }
 0x2b3   : > { %3143 = vst.msk [vmem:[%s4872_s13 + $0x110] sm:$0xff] %vm3108_vm1, %v2734_v12  ;;  %v2726_v3 = vadd.f32 %v4864_v22, %v2725_v61 }
 0x2b4   : > { %v3990_v27 = vpop.f32.mrf.mxu0 }
 0x2b5   : > { %3141 = vst.msk [vmem:[%s4872_s13 + $0x100] sm:$0xff] %vm3108_vm1, %v2726_v3  ;;  %v2737_v4 = vadd.f32 %v3990_v27, %v4864_v22 }
 0x2b6   : > { %v2728_v28 = vpop.f32.mrf.mxu0 }
 0x2b7   : > { %3144 = vst.msk [vmem:[%s4872_s13 + $0x118] sm:$0xff] %vm3108_vm1, %v2737_v4  ;;  %v2729_v34 = vadd.f32 %v4864_v22, %v2728_v28 }
 0x2b8   : > { %v3993_v38 = vpop.f32.mrf.mxu0 }
 0x2b9   : > { %3142 = vst.msk [vmem:[%s4872_s13 + $0x108] sm:$0xff] %vm3108_vm1, %v2729_v34  ;;  %v2750_v32 = vadd.f32 %v3993_v38, %v4864_v22 }
 0x2ba   : > { %v2741_v2 = vpop.f32.mrf.mxu0 }
 0x2bb   : > { %3147 = vst.msk [vmem:[%s4872_s13 + $0x130] sm:$0xff] %vm3108_vm1, %v2750_v32  ;;  %v2742_v60 = vadd.f32 %v4864_v22, %v2741_v2 }
 0x2bc   : > { %v3994_v40 = vpop.f32.mrf.mxu0 }
 0x2bd   : > { %3145 = vst.msk [vmem:[%s4872_s13 + $0x120] sm:$0xff] %vm3108_vm1, %v2742_v60  ;;  %v2753_v54 = vadd.f32 %v3994_v40, %v4864_v22 }
 0x2be   : > { %v2744_v35 = vpop.f32.mrf.mxu0 }
 0x2bf   : > { %3148 = vst.msk [vmem:[%s4872_s13 + $0x138] sm:$0xff] %vm3108_vm1, %v2753_v54  ;;  %v2745_v9 = vadd.f32 %v4864_v22, %v2744_v35 }
 0x2c0   : > { %v3997_v37 = vpop.f32.mrf.mxu0 }
 0x2c1   : > { %3146 = vst.msk [vmem:[%s4872_s13 + $0x128] sm:$0xff] %vm3108_vm1, %v2745_v9  ;;  %v2766_v23 = vadd.f32 %v3997_v37, %v4864_v22 }
 0x2c2   : > { %v2757_v42 = vpop.f32.mrf.mxu0 }
 0x2c3   : > { %3151 = vst.msk [vmem:[%s4872_s13 + $0x150] sm:$0xff] %vm3108_vm1, %v2766_v23  ;;  %v2758_v47 = vadd.f32 %v4864_v22, %v2757_v42 }
 0x2c4   : > { %v3998_v59 = vpop.f32.mrf.mxu0 }
 0x2c5   : > { %3149 = vst.msk [vmem:[%s4872_s13 + $0x140] sm:$0xff] %vm3108_vm1, %v2758_v47  ;;  %v2769_v16 = vadd.f32 %v3998_v59, %v4864_v22 }
 0x2c6   : > { %v2760_v50 = vpop.f32.mrf.mxu0 }
 0x2c7   : > { %3152 = vst.msk [vmem:[%s4872_s13 + $0x158] sm:$0xff] %vm3108_vm1, %v2769_v16  ;;  %v2761_v10 = vadd.f32 %v4864_v22, %v2760_v50 }
 0x2c8   : > { %v4001_v24 = vpop.f32.mrf.mxu0 }
 0x2c9   : > { %3150 = vst.msk [vmem:[%s4872_s13 + $0x148] sm:$0xff] %vm3108_vm1, %v2761_v10  ;;  %v2782_v57 = vadd.f32 %v4001_v24, %v4864_v22 }
 0x2ca   : > { %v2773_v58 = vpop.f32.mrf.mxu0 }
 0x2cb   : > { %3155 = vst.msk [vmem:[%s4872_s13 + $0x170] sm:$0xff] %vm3108_vm1, %v2782_v57  ;;  %v2774_v14 = vadd.f32 %v4864_v22, %v2773_v58 }
 0x2cc   : > { %v4002_v63 = vpop.f32.mrf.mxu0 }
 0x2cd   : > { %3153 = vst.msk [vmem:[%s4872_s13 + $0x160] sm:$0xff] %vm3108_vm1, %v2774_v14  ;;  %v2785_v53 = vadd.f32 %v4002_v63, %v4864_v22 }
 0x2ce   : > { %v2776_v30 = vpop.f32.mrf.mxu0 }
 0x2cf   : > { %3156 = vst.msk [vmem:[%s4872_s13 + $0x178] sm:$0xff] %vm3108_vm1, %v2785_v53  ;;  %v2777_v21 = vadd.f32 %v4864_v22, %v2776_v30 }
 0x2d0   : > { %v4005_v33 = vpop.f32.mrf.mxu0 }
 0x2d1   : > { %3154 = vst.msk [vmem:[%s4872_s13 + $0x168] sm:$0xff] %vm3108_vm1, %v2777_v21  ;;  %v2798_v46 = vadd.f32 %v4005_v33, %v4864_v22 }
 0x2d2   : > { %v2789_v5 = vpop.f32.mrf.mxu0 }
 0x2d3   : > { %3159 = vst.msk [vmem:[%s4872_s13 + $0x190] sm:$0xff] %vm3108_vm1, %v2798_v46  ;;  %v2790_v31 = vadd.f32 %v4864_v22, %v2789_v5 }
 0x2d4   : > { %v4006_v55 = vpop.f32.mrf.mxu0 }
 0x2d5   : > { %3157 = vst.msk [vmem:[%s4872_s13 + $0x180] sm:$0xff] %vm3108_vm1, %v2790_v31  ;;  %v2801_v25 = vadd.f32 %v4006_v55, %v4864_v22 }
 0x2d6   : > { %v2792_v7 = vpop.f32.mrf.mxu0 }
 0x2d7   : > { %3160 = vst.msk [vmem:[%s4872_s13 + $0x198] sm:$0xff] %vm3108_vm1, %v2801_v25  ;;  %v2793_v15 = vadd.f32 %v4864_v22, %v2792_v7 }
 0x2d8   : > { %v4009_v44 = vpop.f32.mrf.mxu0 }
 0x2d9   : > { %3158 = vst.msk [vmem:[%s4872_s13 + $0x188] sm:$0xff] %vm3108_vm1, %v2793_v15  ;;  %v2814_v0 = vadd.f32 %v4009_v44, %v4864_v22 }
 0x2da   : > { %v2805_v56 = vpop.f32.mrf.mxu0 }
 0x2db   : > { %3163 = vst.msk [vmem:[%s4872_s13 + $0x1b0] sm:$0xff] %vm3108_vm1, %v2814_v0  ;;  %v2806_v8 = vadd.f32 %v4864_v22, %v2805_v56 }
 0x2dc   : > { %v4010_v20 = vpop.f32.mrf.mxu0 }
 0x2dd   : > { %3161 = vst.msk [vmem:[%s4872_s13 + $0x1a0] sm:$0xff] %vm3108_vm1, %v2806_v8  ;;  %v2817_v11 = vadd.f32 %v4010_v20, %v4864_v22 }
 0x2de   : > { %v2808_v6 = vpop.f32.mrf.mxu0 }
 0x2df   : > { %3164 = vst.msk [vmem:[%s4872_s13 + $0x1b8] sm:$0xff] %vm3108_vm1, %v2817_v11  ;;  %v2809_v45 = vadd.f32 %v4864_v22, %v2808_v6 }
 0x2e0   : > { %v4013_v39 = vpop.f32.mrf.mxu0 }
 0x2e1   : > { %3162 = vst.msk [vmem:[%s4872_s13 + $0x1a8] sm:$0xff] %vm3108_vm1, %v2809_v45  ;;  %v2830_v62 = vadd.f32 %v4013_v39, %v4864_v22 }
 0x2e2   : > { %v2821_v18 = vpop.f32.mrf.mxu0 }
 0x2e3   : > { %3167 = vst.msk [vmem:[%s4872_s13 + $0x1d0] sm:$0xff] %vm3108_vm1, %v2830_v62  ;;  %v2822_v13 = vadd.f32 %v4864_v22, %v2821_v18 }
 0x2e4   : > { %v4014_v36 = vpop.f32.mrf.mxu0 }
 0x2e5   : > { %3165 = vst.msk [vmem:[%s4872_s13 + $0x1c0] sm:$0xff] %vm3108_vm1, %v2822_v13  ;;  %v2833_v49 = vadd.f32 %v4014_v36, %v4864_v22 }
 0x2e6   : > { %v2824_v52 = vpop.f32.mrf.mxu0 }
 0x2e7   : > { %3168 = vst.msk [vmem:[%s4872_s13 + $0x1d8] sm:$0xff] %vm3108_vm1, %v2833_v49  ;;  %v2825_v19 = vadd.f32 %v4864_v22, %v2824_v52 }
 0x2e8   : > { %v4017_v48 = vpop.f32.mrf.mxu0 }
 0x2e9   : > { %3166 = vst.msk [vmem:[%s4872_s13 + $0x1c8] sm:$0xff] %vm3108_vm1, %v2825_v19  ;;  %v2846_v29 = vadd.f32 %v4017_v48, %v4864_v22 }
 0x2ea   : > { %v2837_v17 = vpop.f32.mrf.mxu0 }
 0x2eb   : > { %3171 = vst.msk [vmem:[%s4872_s13 + $0x1f0] sm:$0xff] %vm3108_vm1, %v2846_v29  ;;  %v2838_v41 = vadd.f32 %v4864_v22, %v2837_v17 }
 0x2ec   : > { %v4018_v43 = vpop.f32.mrf.mxu0 }
 0x2ed   : > { %3169 = vst.msk [vmem:[%s4872_s13 + $0x1e0] sm:$0xff] %vm3108_vm1, %v2838_v41  ;;  %v2849_v51 = vadd.f32 %v4018_v43, %v4864_v22 }
 0x2ee   : > { %v2840_v26 = vpop.f32.mrf.mxu0 }
 0x2ef   : > { %3172 = vst.msk [vmem:[%s4872_s13 + $0x1f8] sm:$0xff] %vm3108_vm1, %v2849_v51  ;;  %v2841_v1 = vadd.f32 %v4864_v22, %v2840_v26 }
 0x2f0   : > { %v4021_v12 = vpop.f32.mrf.mxu0 }
 0x2f1   : > { %3170 = vst.msk [vmem:[%s4872_s13 + $0x1e8] sm:$0xff] %vm3108_vm1, %v2841_v1  ;;  %v2862_v61 = vadd.f32 %v4021_v12, %v4864_v22 }
 0x2f2   : > { %v2853_v3 = vpop.f32.mrf.mxu0 }
 0x2f3   : > { %3175 = vst.msk [vmem:[%s4872_s13 + $0x210] sm:$0xff] %vm3108_vm1, %v2862_v61  ;;  %v2854_v27 = vadd.f32 %v4864_v22, %v2853_v3 }
 0x2f4   : > { %v4022_v4 = vpop.f32.mrf.mxu0 }
 0x2f5   : > { %3173 = vst.msk [vmem:[%s4872_s13 + $0x200] sm:$0xff] %vm3108_vm1, %v2854_v27  ;;  %v2865_v28 = vadd.f32 %v4022_v4, %v4864_v22 }
 0x2f6   : > { %v2856_v34 = vpop.f32.mrf.mxu0 }
 0x2f7   : > { %3176 = vst.msk [vmem:[%s4872_s13 + $0x218] sm:$0xff] %vm3108_vm1, %v2865_v28  ;;  %v2857_v38 = vadd.f32 %v4864_v22, %v2856_v34 }
 0x2f8   : > { %v4025_v32 = vpop.f32.mrf.mxu0 }
 0x2f9   : > { %3174 = vst.msk [vmem:[%s4872_s13 + $0x208] sm:$0xff] %vm3108_vm1, %v2857_v38  ;;  %v2878_v2 = vadd.f32 %v4025_v32, %v4864_v22 }
 0x2fa   : > { %v2869_v60 = vpop.f32.mrf.mxu0 }
 0x2fb   : > { %3179 = vst.msk [vmem:[%s4872_s13 + $0x230] sm:$0xff] %vm3108_vm1, %v2878_v2  ;;  %v2870_v40 = vadd.f32 %v4864_v22, %v2869_v60 }
 0x2fc   : > { %v4026_v54 = vpop.f32.mrf.mxu0 }
 0x2fd   : > { %3177 = vst.msk [vmem:[%s4872_s13 + $0x220] sm:$0xff] %vm3108_vm1, %v2870_v40  ;;  %v2881_v35 = vadd.f32 %v4026_v54, %v4864_v22 }
 0x2fe   : > { %v2872_v9 = vpop.f32.mrf.mxu0 }
 0x2ff   : > { %3180 = vst.msk [vmem:[%s4872_s13 + $0x238] sm:$0xff] %vm3108_vm1, %v2881_v35  ;;  %v2873_v37 = vadd.f32 %v4864_v22, %v2872_v9 }
 0x300   : > { %v4029_v23 = vpop.f32.mrf.mxu0 }
 0x301   : > { %3178 = vst.msk [vmem:[%s4872_s13 + $0x228] sm:$0xff] %vm3108_vm1, %v2873_v37  ;;  %v2894_v42 = vadd.f32 %v4029_v23, %v4864_v22 }
 0x302   : > { %v2885_v47 = vpop.f32.mrf.mxu0 }
 0x303   : > { %3183 = vst.msk [vmem:[%s4872_s13 + $0x250] sm:$0xff] %vm3108_vm1, %v2894_v42  ;;  %v2886_v59 = vadd.f32 %v4864_v22, %v2885_v47 }
 0x304   : > { %v4030_v16 = vpop.f32.mrf.mxu0 }
 0x305   : > { %3181 = vst.msk [vmem:[%s4872_s13 + $0x240] sm:$0xff] %vm3108_vm1, %v2886_v59  ;;  %v2897_v50 = vadd.f32 %v4030_v16, %v4864_v22 }
 0x306   : > { %v2888_v10 = vpop.f32.mrf.mxu0 }
 0x307   : > { %3184 = vst.msk [vmem:[%s4872_s13 + $0x258] sm:$0xff] %vm3108_vm1, %v2897_v50  ;;  %v2889_v24 = vadd.f32 %v4864_v22, %v2888_v10 }
 0x308   : > { %v4033_v57 = vpop.f32.mrf.mxu0 }
 0x309   : > { %3182 = vst.msk [vmem:[%s4872_s13 + $0x248] sm:$0xff] %vm3108_vm1, %v2889_v24  ;;  %v2910_v58 = vadd.f32 %v4033_v57, %v4864_v22 }
 0x30a   : > { %v2901_v14 = vpop.f32.mrf.mxu0 }
 0x30b   : > { %3187 = vst.msk [vmem:[%s4872_s13 + $0x270] sm:$0xff] %vm3108_vm1, %v2910_v58  ;;  %v2902_v63 = vadd.f32 %v4864_v22, %v2901_v14 }
 0x30c   : > { %v4034_v53 = vpop.f32.mrf.mxu0 }
 0x30d   : > { %3185 = vst.msk [vmem:[%s4872_s13 + $0x260] sm:$0xff] %vm3108_vm1, %v2902_v63  ;;  %v2913_v30 = vadd.f32 %v4034_v53, %v4864_v22 }
 0x30e   : > { %v2904_v21 = vpop.f32.mrf.mxu0 }
 0x30f   : > { %3188 = vst.msk [vmem:[%s4872_s13 + $0x278] sm:$0xff] %vm3108_vm1, %v2913_v30  ;;  %v2905_v33 = vadd.f32 %v4864_v22, %v2904_v21 }
 0x310   : > { %v4037_v46 = vpop.f32.mrf.mxu0 }
 0x311   : > { %3186 = vst.msk [vmem:[%s4872_s13 + $0x268] sm:$0xff] %vm3108_vm1, %v2905_v33  ;;  %v2926_v5 = vadd.f32 %v4037_v46, %v4864_v22 }
 0x312   : > { %v2917_v31 = vpop.f32.mrf.mxu0 }
 0x313   : > { %3191 = vst.msk [vmem:[%s4872_s13 + $0x290] sm:$0xff] %vm3108_vm1, %v2926_v5  ;;  %v2918_v55 = vadd.f32 %v4864_v22, %v2917_v31 }
 0x314   : > { %v4038_v25 = vpop.f32.mrf.mxu0 }
 0x315   : > { %3189 = vst.msk [vmem:[%s4872_s13 + $0x280] sm:$0xff] %vm3108_vm1, %v2918_v55  ;;  %v2929_v7 = vadd.f32 %v4038_v25, %v4864_v22 }
 0x316   : > { %v2920_v15 = vpop.f32.mrf.mxu0 }
 0x317   : > { %3192 = vst.msk [vmem:[%s4872_s13 + $0x298] sm:$0xff] %vm3108_vm1, %v2929_v7  ;;  %v2921_v44 = vadd.f32 %v4864_v22, %v2920_v15 }
 0x318   : > { %v4041_v0 = vpop.f32.mrf.mxu0 }
 0x319   : > { %3190 = vst.msk [vmem:[%s4872_s13 + $0x288] sm:$0xff] %vm3108_vm1, %v2921_v44  ;;  %v2942_v56 = vadd.f32 %v4041_v0, %v4864_v22 }
 0x31a   : > { %v2933_v8 = vpop.f32.mrf.mxu0 }
 0x31b   : > { %3195 = vst.msk [vmem:[%s4872_s13 + $0x2b0] sm:$0xff] %vm3108_vm1, %v2942_v56  ;;  %v2934_v20 = vadd.f32 %v4864_v22, %v2933_v8 }
 0x31c   : > { %v4042_v11 = vpop.f32.mrf.mxu0 }
 0x31d   : > { %3193 = vst.msk [vmem:[%s4872_s13 + $0x2a0] sm:$0xff] %vm3108_vm1, %v2934_v20  ;;  %v2945_v6 = vadd.f32 %v4042_v11, %v4864_v22 }
 0x31e   : > { %v2936_v45 = vpop.f32.mrf.mxu0 }
 0x31f   : > { %3196 = vst.msk [vmem:[%s4872_s13 + $0x2b8] sm:$0xff] %vm3108_vm1, %v2945_v6  ;;  %v2937_v39 = vadd.f32 %v4864_v22, %v2936_v45 }
 0x320   : > { %v4045_v62 = vpop.f32.mrf.mxu0 }
 0x321   : > { %3194 = vst.msk [vmem:[%s4872_s13 + $0x2a8] sm:$0xff] %vm3108_vm1, %v2937_v39  ;;  %v2958_v18 = vadd.f32 %v4045_v62, %v4864_v22 }
 0x322   : > { %v2949_v13 = vpop.f32.mrf.mxu0 }
 0x323   : > { %3199 = vst.msk [vmem:[%s4872_s13 + $0x2d0] sm:$0xff] %vm3108_vm1, %v2958_v18  ;;  %v2950_v36 = vadd.f32 %v4864_v22, %v2949_v13 }
 0x324   : > { %v4046_v49 = vpop.f32.mrf.mxu0 }
 0x325   : > { %3197 = vst.msk [vmem:[%s4872_s13 + $0x2c0] sm:$0xff] %vm3108_vm1, %v2950_v36  ;;  %v2961_v52 = vadd.f32 %v4046_v49, %v4864_v22 }
 0x326   : > { %v2952_v19 = vpop.f32.mrf.mxu0 }
 0x327   : > { %3200 = vst.msk [vmem:[%s4872_s13 + $0x2d8] sm:$0xff] %vm3108_vm1, %v2961_v52  ;;  %v2953_v48 = vadd.f32 %v4864_v22, %v2952_v19 }
 0x328   : > { %v4049_v29 = vpop.f32.mrf.mxu0 }
 0x329   : > { %3198 = vst.msk [vmem:[%s4872_s13 + $0x2c8] sm:$0xff] %vm3108_vm1, %v2953_v48  ;;  %v2974_v17 = vadd.f32 %v4049_v29, %v4864_v22 }
 0x32a   : > { %v2965_v41 = vpop.f32.mrf.mxu0 }
 0x32b   : > { %3203 = vst.msk [vmem:[%s4872_s13 + $0x2f0] sm:$0xff] %vm3108_vm1, %v2974_v17  ;;  %v2966_v43 = vadd.f32 %v4864_v22, %v2965_v41 }
 0x32c   : > { %v4050_v51 = vpop.f32.mrf.mxu0 }
 0x32d   : > { %3201 = vst.msk [vmem:[%s4872_s13 + $0x2e0] sm:$0xff] %vm3108_vm1, %v2966_v43  ;;  %v2977_v26 = vadd.f32 %v4050_v51, %v4864_v22 }
 0x32e   : > { %v2968_v1 = vpop.f32.mrf.mxu0 }
 0x32f   : > { %3204 = vst.msk [vmem:[%s4872_s13 + $0x2f8] sm:$0xff] %vm3108_vm1, %v2977_v26  ;;  %v2969_v12 = vadd.f32 %v4864_v22, %v2968_v1 }
 0x330   : > { %v4053_v61 = vpop.f32.mrf.mxu0 }
 0x331   : > { %3202 = vst.msk [vmem:[%s4872_s13 + $0x2e8] sm:$0xff] %vm3108_vm1, %v2969_v12  ;;  %v2990_v3 = vadd.f32 %v4053_v61, %v4864_v22 }
 0x332   : > { %v2981_v27 = vpop.f32.mrf.mxu0 }
 0x333   : > { %3207 = vst.msk [vmem:[%s4872_s13 + $0x310] sm:$0xff] %vm3108_vm1, %v2990_v3  ;;  %v2982_v4 = vadd.f32 %v4864_v22, %v2981_v27 }
 0x334   : > { %v4054_v28 = vpop.f32.mrf.mxu0 }
 0x335   : > { %3205 = vst.msk [vmem:[%s4872_s13 + $0x300] sm:$0xff] %vm3108_vm1, %v2982_v4  ;;  %v2993_v34 = vadd.f32 %v4054_v28, %v4864_v22 }
 0x336   : > { %v2984_v38 = vpop.f32.mrf.mxu0 }
 0x337   : > { %3208 = vst.msk [vmem:[%s4872_s13 + $0x318] sm:$0xff] %vm3108_vm1, %v2993_v34  ;;  %v2985_v32 = vadd.f32 %v4864_v22, %v2984_v38 }
 0x338   : > { %v4057_v2 = vpop.f32.mrf.mxu0 }
 0x339   : > { %3206 = vst.msk [vmem:[%s4872_s13 + $0x308] sm:$0xff] %vm3108_vm1, %v2985_v32  ;;  %v3006_v60 = vadd.f32 %v4057_v2, %v4864_v22 }
 0x33a   : > { %v2997_v40 = vpop.f32.mrf.mxu0 }
 0x33b   : > { %3211 = vst.msk [vmem:[%s4872_s13 + $0x330] sm:$0xff] %vm3108_vm1, %v3006_v60  ;;  %v2998_v54 = vadd.f32 %v4864_v22, %v2997_v40 }
 0x33c   : > { %v4058_v35 = vpop.f32.mrf.mxu0 }
 0x33d   : > { %3209 = vst.msk [vmem:[%s4872_s13 + $0x320] sm:$0xff] %vm3108_vm1, %v2998_v54  ;;  %v3009_v9 = vadd.f32 %v4058_v35, %v4864_v22 }
 0x33e   : > { %v3000_v37 = vpop.f32.mrf.mxu0 }
 0x33f   : > { %3212 = vst.msk [vmem:[%s4872_s13 + $0x338] sm:$0xff] %vm3108_vm1, %v3009_v9  ;;  %v3001_v23 = vadd.f32 %v4864_v22, %v3000_v37 }
 0x340   : > { %v4061_v42 = vpop.f32.mrf.mxu0 }
 0x341   : > { %3210 = vst.msk [vmem:[%s4872_s13 + $0x328] sm:$0xff] %vm3108_vm1, %v3001_v23  ;;  %v3022_v47 = vadd.f32 %v4061_v42, %v4864_v22 }
 0x342   : > { %v3013_v59 = vpop.f32.mrf.mxu0 }
 0x343   : > { %3215 = vst.msk [vmem:[%s4872_s13 + $0x350] sm:$0xff] %vm3108_vm1, %v3022_v47  ;;  %v3014_v16 = vadd.f32 %v4864_v22, %v3013_v59 }
 0x344   : > { %v4062_v50 = vpop.f32.mrf.mxu0 }
 0x345   : > { %3213 = vst.msk [vmem:[%s4872_s13 + $0x340] sm:$0xff] %vm3108_vm1, %v3014_v16  ;;  %v3025_v10 = vadd.f32 %v4062_v50, %v4864_v22 }
 0x346   : > { %v3016_v24 = vpop.f32.mrf.mxu0 }
 0x347   : > { %3216 = vst.msk [vmem:[%s4872_s13 + $0x358] sm:$0xff] %vm3108_vm1, %v3025_v10  ;;  %v3017_v57 = vadd.f32 %v4864_v22, %v3016_v24 }
 0x348   : > { %v4065_v58 = vpop.f32.mrf.mxu0 }
 0x349   : > { %3214 = vst.msk [vmem:[%s4872_s13 + $0x348] sm:$0xff] %vm3108_vm1, %v3017_v57  ;;  %v3038_v14 = vadd.f32 %v4065_v58, %v4864_v22 }
 0x34a   : > { %v3029_v63 = vpop.f32.mrf.mxu0 }
 0x34b   : > { %3219 = vst.msk [vmem:[%s4872_s13 + $0x370] sm:$0xff] %vm3108_vm1, %v3038_v14  ;;  %v3030_v53 = vadd.f32 %v4864_v22, %v3029_v63 }
 0x34c   : > { %v4066_v30 = vpop.f32.mrf.mxu0 }
 0x34d   : > { %3217 = vst.msk [vmem:[%s4872_s13 + $0x360] sm:$0xff] %vm3108_vm1, %v3030_v53  ;;  %v3041_v21 = vadd.f32 %v4066_v30, %v4864_v22 }
 0x34e   : > { %v3032_v33 = vpop.f32.mrf.mxu0 }
 0x34f   : > { %3220 = vst.msk [vmem:[%s4872_s13 + $0x378] sm:$0xff] %vm3108_vm1, %v3041_v21  ;;  %v3033_v46 = vadd.f32 %v4864_v22, %v3032_v33 }
 0x350   : > { %v4069_v5 = vpop.f32.mrf.mxu0 }
 0x351   : > { %3218 = vst.msk [vmem:[%s4872_s13 + $0x368] sm:$0xff] %vm3108_vm1, %v3033_v46  ;;  %v3054_v31 = vadd.f32 %v4069_v5, %v4864_v22 }
 0x352   : > { %v3045_v55 = vpop.f32.mrf.mxu0 }
 0x353   : > { %3223 = vst.msk [vmem:[%s4872_s13 + $0x390] sm:$0xff] %vm3108_vm1, %v3054_v31  ;;  %v3046_v25 = vadd.f32 %v4864_v22, %v3045_v55 }
 0x354   : > { %v4070_v7 = vpop.f32.mrf.mxu0 }
 0x355   : > { %3221 = vst.msk [vmem:[%s4872_s13 + $0x380] sm:$0xff] %vm3108_vm1, %v3046_v25  ;;  %v3057_v15 = vadd.f32 %v4070_v7, %v4864_v22 }
 0x356   : > { %v3048_v44 = vpop.f32.mrf.mxu0 }
 0x357   : > { %3224 = vst.msk [vmem:[%s4872_s13 + $0x398] sm:$0xff] %vm3108_vm1, %v3057_v15  ;;  %v3049_v0 = vadd.f32 %v4864_v22, %v3048_v44 }
 0x358   : > { %v4073_v56 = vpop.f32.mrf.mxu0 }
 0x359   : > { %3222 = vst.msk [vmem:[%s4872_s13 + $0x388] sm:$0xff] %vm3108_vm1, %v3049_v0  ;;  %v3070_v8 = vadd.f32 %v4073_v56, %v4864_v22 }
 0x35a   : > { %v3061_v20 = vpop.f32.mrf.mxu0 }
 0x35b   : > { %3227 = vst.msk [vmem:[%s4872_s13 + $0x3b0] sm:$0xff] %vm3108_vm1, %v3070_v8  ;;  %v3062_v11 = vadd.f32 %v4864_v22, %v3061_v20 }
 0x35c   : > { %v4074_v6 = vpop.f32.mrf.mxu0 }
 0x35d   : > { %3225 = vst.msk [vmem:[%s4872_s13 + $0x3a0] sm:$0xff] %vm3108_vm1, %v3062_v11  ;;  %v3073_v45 = vadd.f32 %v4074_v6, %v4864_v22 }
 0x35e   : > { %v3064_v39 = vpop.f32.mrf.mxu0 }
 0x35f   : > { %3228 = vst.msk [vmem:[%s4872_s13 + $0x3b8] sm:$0xff] %vm3108_vm1, %v3073_v45  ;;  %v3065_v62 = vadd.f32 %v4864_v22, %v3064_v39 }
 0x360   : > { %v4077_v18 = vpop.f32.mrf.mxu0 }
 0x361   : > { %3226 = vst.msk [vmem:[%s4872_s13 + $0x3a8] sm:$0xff] %vm3108_vm1, %v3065_v62  ;;  %v3086_v13 = vadd.f32 %v4077_v18, %v4864_v22 }
 0x362   : > { %v3077_v36 = vpop.f32.mrf.mxu0 }
 0x363   : > { %3231 = vst.msk [vmem:[%s4872_s13 + $0x3d0] sm:$0xff] %vm3108_vm1, %v3086_v13  ;;  %v3078_v49 = vadd.f32 %v4864_v22, %v3077_v36 }
 0x364   : > { %v4078_v52 = vpop.f32.mrf.mxu0 }
 0x365   : > { %3229 = vst.msk [vmem:[%s4872_s13 + $0x3c0] sm:$0xff] %vm3108_vm1, %v3078_v49  ;;  %v3089_v19 = vadd.f32 %v4078_v52, %v4864_v22 }
 0x366   : > { %v3080_v48 = vpop.f32.mrf.mxu0 }
 0x367   : > { %3232 = vst.msk [vmem:[%s4872_s13 + $0x3d8] sm:$0xff] %vm3108_vm1, %v3089_v19  ;;  %v3081_v29 = vadd.f32 %v4864_v22, %v3080_v48 }
 0x368   : > { %v4081_v17 = vpop.f32.mrf.mxu0 }
 0x369   : > { %3230 = vst.msk [vmem:[%s4872_s13 + $0x3c8] sm:$0xff] %vm3108_vm1, %v3081_v29  ;;  %v3102_v41 = vadd.f32 %v4081_v17, %v4864_v22 }
 0x36a   : > { %v3093_v43 = vpop.f32.mrf.mxu0 }
 0x36b   : > { %3235 = vst.msk [vmem:[%s4872_s13 + $0x3f0] sm:$0xff] %vm3108_vm1, %v3102_v41  ;;  %v3094_v51 = vadd.f32 %v4864_v22, %v3093_v43 }
 0x36c   : > { %v4082_v26 = vpop.f32.mrf.mxu0 }
 0x36d   : > { %3233 = vst.msk [vmem:[%s4872_s13 + $0x3e0] sm:$0xff] %vm3108_vm1, %v3094_v51  ;;  %v3105_v1 = vadd.f32 %v4082_v26, %v4864_v22 }
 0x36e   : > { %v3096_v12 = vpop.f32.mrf.mxu0 }
 0x36f   : > { %3236 = vst.msk [vmem:[%s4872_s13 + $0x3f8] sm:$0xff] %vm3108_vm1, %v3105_v1  ;;  %v3097_v61 = vadd.f32 %v4864_v22, %v3096_v12 }
 0x371   : > { %3234 = vst.msk [vmem:[%s4872_s13 + $0x3e8] sm:$0xff] %vm3108_vm1, %v3097_v61 }
 0x372 PF: > { %s17_s24 = sadd.s32 1, %s4185_s24  }
 0x373   : > { %p14_p4 = scmp.ge.s32.totalorder %s17_s24, 4  }
 0x375   :  { %16 = sbr.rel (!%p14_p4) target bundleno = 1 (0x1), region = 78 }

</bundles_post_ra>
